<compile_context>
chip_gen: v6e
topology: v6e:2x2x1
jax: 0.10.0
libtpu: 0.0.40
codegen_flags: <defaults>
</compile_context>

<pallas_src>
import functools

import jax
import jax.numpy as jnp
from jax.experimental import pallas as pl
from jax.experimental.pallas import tpu as pltpu

EPS = 1e-5                       # nn.BatchNorm2d default eps
LANE = 128
CONV_VMEM_LIMIT = 48 << 20       # safe scoped-VMEM cap across v5e/v6e/v7x
TILE_VMEM_BUDGET = 20 << 20      # rough budget for the pipelined conv blocks


def _round_up(x, m):
    return (x + m - 1) // m * m


# --------------------------------------------------------------------------
# Kernel 1: conv(3x3, pad=1) + bias on one (batch, H-band) tile, with an
#           optional fused BN+ReLU prologue of the previous stage, plus a
#           per-step partial [sum, sumsq] for the two-phase BatchNorm.
# --------------------------------------------------------------------------
def _conv_band_body(top_ref, main_ref, bot_ref, w_ref, b_ref, scale_ref, shift_ref,
                    y_ref, stats_ref, *, th, w_real, n_h):
    """top/main/bot: (1|th|1, Wp, Cin) bf16 stored rows (W halo cols already zero)
       w_ref: (9, Cin, Cout) bf16   b_ref: (1, Cout) f32
       scale/shift: (1, Cin) f32 or None (fused BN+ReLU of the previous stage)
       y_ref: (th, Wp, Cout) bf16 pre-BN conv output band (W halo cols zero)
       stats_ref: (2, Cout) f32  -- this grid step's own partial [sum, sumsq]."""
    t = pl.program_id(1)
    _, wp, cin = main_ref.shape
    cout = y_ref.shape[-1]

    topv = top_ref[...]
    mainv = main_ref[...]
    botv = bot_ref[...]

    if scale_ref is not None:
        # Fused BatchNorm + ReLU of the previous stage (per-channel affine),
        # applied to the raw stored values (PyTorch zero-pads AFTER BN+ReLU,
        # so the halo is re-zeroed below).
        def act(v):
            return jnp.maximum(v.astype(jnp.float32) * scale_ref[...] + shift_ref[...], 0.0)
        topv, mainv, botv = act(topv), act(mainv), act(botv)

    # Zero the H halo rows at the image borders (clamped DMA brought real rows).
    topv = jnp.where(t > 0, topv, jnp.zeros_like(topv))
    botv = jnp.where(t < n_h - 1, botv, jnp.zeros_like(botv))

    x = jnp.concatenate([topv, mainv, botv], axis=0)          # (th+2, Wp, Cin)

    if scale_ref is not None:
        # The prologue turned the zero W-pad columns into relu(shift); re-zero.
        col = jax.lax.broadcasted_iota(jnp.int32, x.shape, 1)
        col_ok = jnp.logical_and(col >= 1, col < 1 + w_real)
        x = jnp.where(col_ok, x, 0.0)
        x = x.astype(jnp.bfloat16)

    # 3x3 conv as 9 accumulated matmuls (no materialized im2col patch matrix).
    acc = jnp.zeros((th * w_real, cout), jnp.float32)
    for dy in range(3):
        for dx in range(3):
            patch = x[dy:dy + th, dx:dx + w_real, :].reshape(th * w_real, cin)
            acc = acc + jnp.dot(patch, w_ref[dy * 3 + dx],
                                preferred_element_type=jnp.float32)
    acc = acc + b_ref[...]

    # Per-step BN partial stats (f32); each step owns its own stats slot so the
    # whole grid can be "parallel" (megacore-shardable on v7x).
    stats_ref[0:1, :] = jnp.sum(acc, axis=0, keepdims=True)
    stats_ref[1:2, :] = jnp.sum(acc * acc, axis=0, keepdims=True)

    # Store bf16 with the zero W-halo columns re-inserted so the next stage
    # reads lane/sublane dense tiles and never rebuilds the W halo.
    out = acc.reshape(th, w_real, cout).astype(y_ref.dtype)
    zl = jnp.zeros((th, 1, cout), y_ref.dtype)
    zr = jnp.zeros((th, wp - 1 - w_real, cout), y_ref.dtype)
    y_ref[...] = jnp.concatenate([zl, out, zr], axis=1)


def _conv_kernel(top, main, bot, w, b, y, stats, *, th, w_real, n_h):
    _conv_band_body(top, main, bot, w, b, None, None, y, stats,
                    th=th, w_real=w_real, n_h=n_h)


def _conv_kernel_fused(top, main, bot, w, b, scale, shift, y, stats, *, th, w_real, n_h):
    _conv_band_body(top, main, bot, w, b, scale, shift, y, stats,
                    th=th, w_real=w_real, n_h=n_h)


def _conv_bn_stats(x, w_taps, bias, w_real, tile_h, scale=None, shift=None):
    """x: (B, H, Wp, Cin) bf16, data in cols [1, 1+w_real).
       Returns y: (B, H, Wp, Cout) bf16 (pre-BN), stats: (B*n_h, 2, Cout) f32."""
    B, H, Wp, Cin = x.shape
    Cout = w_taps.shape[-1]
    th = tile_h
    assert H % th == 0, (H, th)
    n_h = H // th

    in_specs = [
        # top halo row (clamped at the image top; zeroed in-kernel when t == 0)
        pl.BlockSpec((None, 1, Wp, Cin),
                     lambda b, t: (b, jnp.maximum(t * th - 1, 0), 0, 0)),
        # main TH-row band
        pl.BlockSpec((None, th, Wp, Cin), lambda b, t: (b, t, 0, 0)),
        # bottom halo row (clamped at the image bottom; zeroed when t == n_h-1)
        pl.BlockSpec((None, 1, Wp, Cin),
                     lambda b, t: (b, jnp.minimum(t * th + th, H - 1), 0, 0)),
        pl.BlockSpec(w_taps.shape, lambda b, t: (0, 0, 0)),
        pl.BlockSpec(bias.shape, lambda b, t: (0, 0)),
    ]
    args = [x, x, x, w_taps, bias]
    if scale is None:
        kernel = functools.partial(_conv_kernel, th=th, w_real=w_real, n_h=n_h)
    else:
        in_specs += [pl.BlockSpec(scale.shape, lambda b, t: (0, 0)),
                     pl.BlockSpec(shift.shape, lambda b, t: (0, 0))]
        args += [scale, shift]
        kernel = functools.partial(_conv_kernel_fused, th=th, w_real=w_real, n_h=n_h)

    y, stats = pl.pallas_call(
        kernel,
        grid=(B, n_h),
        in_specs=in_specs,
        out_specs=(
            pl.BlockSpec((None, th, Wp, Cout), lambda b, t: (b, t, 0, 0)),
            pl.BlockSpec((None, 2, Cout), lambda b, t: (b * n_h + t, 0, 0)),
        ),
        out_shape=(
            jax.ShapeDtypeStruct((B, H, Wp, Cout), jnp.bfloat16),
            jax.ShapeDtypeStruct((B * n_h, 2, Cout), jnp.float32),
        ),
        compiler_params=pltpu.CompilerParams(
            dimension_semantics=("parallel", "parallel"),
            vmem_limit_bytes=CONV_VMEM_LIMIT),
    )(*args)
    return y, stats


# --------------------------------------------------------------------------
# Kernel 2: final elementwise BN + ReLU over lane-dense (rows, C) tiles.
# --------------------------------------------------------------------------
def _bn_relu_kernel(y_ref, scale_ref, shift_ref, o_ref):
    y = y_ref[...].astype(jnp.float32)
    o_ref[...] = jnp.maximum(y * scale_ref[...] + shift_ref[...], 0.0).astype(o_ref.dtype)


def _bn_relu(y, scale, shift, out_dtype, tile_rows=1024):
    B, H, Wp, C = y.shape
    M = B * H * Wp
    y2 = y.reshape(M, C)                                       # layout no-op
    tm = min(tile_rows, M)
    out = pl.pallas_call(
        _bn_relu_kernel,
        grid=(pl.cdiv(M, tm),),
        in_specs=[pl.BlockSpec((tm, C), lambda i: (i, 0)),
                  pl.BlockSpec((1, C), lambda i: (0, 0)),
                  pl.BlockSpec((1, C), lambda i: (0, 0))],
        out_specs=pl.BlockSpec((tm, C), lambda i: (i, 0)),
        out_shape=jax.ShapeDtypeStruct((M, C), out_dtype),
        compiler_params=pltpu.CompilerParams(
            dimension_semantics=("parallel",)),
    )(y2, scale, shift)
    return out.reshape(B, H, Wp, C)


# --------------------------------------------------------------------------
# Host-side glue: parameter packing, BN finalize, tile sizing, orchestration.
# --------------------------------------------------------------------------
def _prep_conv(w, b, cin_pad, cout_pad):
    """w:(3,3,Cin,Cout) f32 -> (9, Cin_pad, Cout_pad) bf16; b -> (1, Cout_pad) f32."""
    _, _, cin, cout = w.shape
    w_p = jnp.zeros((3, 3, cin_pad, cout_pad), jnp.float32)
    w_p = w_p.at[:, :, :cin, :cout].set(w)
    w_taps = w_p.reshape(9, cin_pad, cout_pad).astype(jnp.bfloat16)
    b_p = jnp.zeros((1, cout_pad), jnp.float32).at[0, :cout].set(b)
    return w_taps, b_p


def _pad_vec(v, cpad):
    return jnp.zeros((cpad,), jnp.float32).at[: v.shape[0]].set(v)


def _bn_affine(stats, gamma_pad, beta_pad, n):
    """Reduce per-band partials and fold mean/var + gamma/beta into scale/shift."""
    s = jnp.sum(stats, axis=0)                                 # (2, C)
    mean = s[0] / n
    var = jnp.maximum(s[1] / n - mean * mean, 0.0)             # biased variance
    # TODO(synk): E[x^2]-E[x]^2 can lose precision for very large n; switch to a
    #             shifted/Welford accumulation if BN drifts at scale.
    inv_std = jax.lax.rsqrt(var + EPS)
    scale = gamma_pad * inv_std
    shift = beta_pad - mean * scale
    return scale.reshape(1, -1), shift.reshape(1, -1)


def _pick_tile_h(H, Wp, cin_p, cout_p, budget=TILE_VMEM_BUDGET):
    """Largest divisor of H whose pipelined conv working set fits the budget."""
    best = None
    for th in range(1, H + 1):
        if H % th:
            continue
        band_in = th * Wp * cin_p * 2            # bf16 input band
        band_out = th * Wp * cout_p * 2          # bf16 output band
        temps = th * Wp * (cin_p * 6 + cout_p * 4)   # masked copy + f32 accum (rough)
        total = 2 * (band_in + band_out) + temps
        if total <= budget:
            best = th
    return best if best is not None else 1


def double_conv(x_nchw, params, tile_h=None):
    (w1, b1, g1, bt1), (w2, b2, g2, bt2) = params
    B, Cin, H, W = x_nchw.shape
    Cout = w1.shape[-1]
    cin_p = _round_up(Cin, LANE)
    cout_p = _round_up(Cout, LANE)
    Wp = _round_up(W + 2, 8)                      # W halo + sublane-dense width
    n = B * H * W

    th = tile_h if tile_h is not None else _pick_tile_h(H, Wp, max(cin_p, cout_p), cout_p)
    assert H % th == 0, (H, th)

    # NCHW -> NHWC, channel pad to a lane multiple, W halo pad, bf16 for the MXU.
    x = jnp.transpose(x_nchw, (0, 2, 3, 1))
    x = jnp.pad(x, ((0, 0), (0, 0), (1, Wp - 1 - W), (0, cin_p - Cin)))
    x = x.astype(jnp.bfloat16)

    w1t, b1p = _prep_conv(w1, b1, cin_p, cout_p)
    w2t, b2p = _prep_conv(w2, b2, cout_p, cout_p)
    g1p, bt1p = _pad_vec(g1, cout_p), _pad_vec(bt1, cout_p)
    g2p, bt2p = _pad_vec(g2, cout_p), _pad_vec(bt2, cout_p)

    # Stage 1: conv1 + per-band BN1 partial statistics.
    y1, s1 = _conv_bn_stats(x, w1t, b1p, W, th)
    scale1, shift1 = _bn_affine(s1, g1p, bt1p, n)

    # Stage 2: fused (BN1 + ReLU1) prologue + conv2 + per-band BN2 statistics.
    y2, s2 = _conv_bn_stats(y1, w2t, b2p, W, th, scale1, shift1)
    scale2, shift2 = _bn_affine(s2, g2p, bt2p, n)

    # Final elementwise BN2 + ReLU2 in the caller's dtype.
    out = _bn_relu(y2, scale2, shift2, x_nchw.dtype)

    # Strip W-halo / channel padding, NHWC -> NCHW.
    out = out[:, :, 1:1 + W, :Cout]
    return jnp.transpose(out, (0, 3, 1, 2))


def init_double_conv_params(key, in_channels, out_channels):
    """Deterministic init mirroring nn.Conv2d / nn.BatchNorm2d defaults."""
    def conv_init(k, cin, cout):
        kw, kb = jax.random.split(k)
        fan_in = cin * 3 * 3
        bound = 1.0 / jnp.sqrt(fan_in)
        # PyTorch (Cout, Cin, 3, 3) -> kernel layout (3, 3, Cin, Cout)
        w_oihw = jax.random.uniform(kw, (cout, cin, 3, 3), jnp.float32, -bound, bound)
        w = jnp.transpose(w_oihw, (2, 3, 1, 0))
        b = jax.random.uniform(kb, (cout,), jnp.float32, -bound, bound)
        return w, b

    k1, k2 = jax.random.split(key)
    w1, b1 = conv_init(k1, in_channels, out_channels)
    w2, b2 = conv_init(k2, out_channels, out_channels)
    g1 = jnp.ones((out_channels,), jnp.float32)
    bt1 = jnp.zeros((out_channels,), jnp.float32)
    g2 = jnp.ones((out_channels,), jnp.float32)
    bt2 = jnp.zeros((out_channels,), jnp.float32)
    return (w1, b1, g1, bt1), (w2, b2, g2, bt2)


def _reference_double_conv(x_nchw, params):
    """Pure-JAX f32 reference (PyTorch training-mode forward semantics)."""
    (w1, b1, g1, bt1), (w2, b2, g2, bt2) = params

    def stage(x, w, b, g, bt):
        y = jax.lax.conv_general_dilated(
            x, w, window_strides=(1, 1), padding="SAME",
            dimension_numbers=("NHWC", "HWIO", "NHWC")) + b
        mean = jnp.mean(y, axis=(0, 1, 2))
        var = jnp.mean((y - mean) ** 2, axis=(0, 1, 2))
        y = (y - mean) * jax.lax.rsqrt(var + EPS) * g + bt
        return jnp.maximum(y, 0.0)

    x = jnp.transpose(x_nchw, (0, 2, 3, 1))
    x = stage(x, w1, b1, g1, bt1)
    x = stage(x, w2, b2, g2, bt2)
    return jnp.transpose(x, (0, 3, 1, 2))


if __name__ == "__main__":
    B, CIN, COUT, H, W = 2, 4, 8, 16, 16
    key = jax.random.PRNGKey(0)
    kx, kp = jax.random.split(key)

    x = jax.random.normal(kx, (B, CIN, H, W), jnp.float32)
    params = init_double_conv_params(kp, CIN, COUT)

    # tile_h=8 -> two H-bands per image: exercises the halo-row / band-tiling path.
    out = jax.block_until_ready(double_conv(x, params, tile_h=8))

    assert out.shape == (B, COUT, H, W), out.shape
    assert bool(jnp.all(jnp.isfinite(out)))

    # Loose tolerance: bf16 MXU inputs + bf16 inter-stage storage vs f32 reference.
    ref = jax.block_until_ready(_reference_double_conv(x, params))
    max_err = float(jnp.max(jnp.abs(out - ref)))
    assert max_err < 0.25, max_err

    print("KERNEL_OK")
</pallas_src>

<mosaic_0001>
module attributes {stable_mosaic.version = 11 : i64} {
  func.func @_conv_kernel(%arg0: i32, %arg1: i32, %arg2: memref<1x1x24x128xbf16, #tpu.memory_space<vmem>>, %arg3: memref<1x8x24x128xbf16, #tpu.memory_space<vmem>>, %arg4: memref<1x1x24x128xbf16, #tpu.memory_space<vmem>>, %arg5: memref<9x128x128xbf16, #tpu.memory_space<vmem>>, %arg6: memref<1x128xf32, #tpu.memory_space<vmem>>, %arg7: memref<1x8x24x128xbf16, #tpu.memory_space<vmem>>, %arg8: memref<1x2x128xf32, #tpu.memory_space<vmem>>) attributes {dimension_semantics = [#tpu.dimension_semantics<parallel>, #tpu.dimension_semantics<parallel>], iteration_bounds = array<i64: 2, 2>, scalar_prefetch = 0 : i64, scratch_operands = 0 : i64, tpu.core_type = #tpu.core_type<tc>, window_params = [{transform_indices = @transform_0, window_bounds = array<i64: 1, 1, 24, 128>}, {transform_indices = @transform_1, window_bounds = array<i64: 1, 8, 24, 128>}, {transform_indices = @transform_2, window_bounds = array<i64: 1, 1, 24, 128>}, {pipeline_mode = #tpu.pipeline_mode<synchronous>, transform_indices = @transform_3, window_bounds = array<i64: 9, 128, 128>}, {pipeline_mode = #tpu.pipeline_mode<synchronous>, transform_indices = @transform_4, window_bounds = array<i64: 1, 128>}, {transform_indices = @transform_5, window_bounds = array<i64: 1, 8, 24, 128>}, {transform_indices = @transform_6, window_bounds = array<i64: 1, 2, 128>}]} {
    %c0 = arith.constant 0 : index
    %c0_0 = arith.constant 0 : index
    %c0_1 = arith.constant 0 : index
    %c0_2 = arith.constant 0 : index
    %0 = vector.load %arg2[%c0, %c0_0, %c0_1, %c0_2] : memref<1x1x24x128xbf16, #tpu.memory_space<vmem>>, vector<1x1x24x128xbf16>
    %1 = vector.shape_cast %0 : vector<1x1x24x128xbf16> to vector<1x24x128xbf16>
    %c0_3 = arith.constant 0 : index
    %c0_4 = arith.constant 0 : index
    %c0_5 = arith.constant 0 : index
    %c0_6 = arith.constant 0 : index
    %2 = vector.load %arg3[%c0_3, %c0_4, %c0_5, %c0_6] : memref<1x8x24x128xbf16, #tpu.memory_space<vmem>>, vector<1x8x24x128xbf16>
    %3 = vector.shape_cast %2 : vector<1x8x24x128xbf16> to vector<8x24x128xbf16>
    %c0_7 = arith.constant 0 : index
    %c0_8 = arith.constant 0 : index
    %c0_9 = arith.constant 0 : index
    %c0_10 = arith.constant 0 : index
    %4 = vector.load %arg4[%c0_7, %c0_8, %c0_9, %c0_10] : memref<1x1x24x128xbf16, #tpu.memory_space<vmem>>, vector<1x1x24x128xbf16>
    %5 = vector.shape_cast %4 : vector<1x1x24x128xbf16> to vector<1x24x128xbf16>
    %c0_i32 = arith.constant 0 : i32
    %6 = arith.cmpi sgt, %arg1, %c0_i32 : i32
    %cst = arith.constant 0.000000e+00 : bf16
    %7 = vector.broadcast %cst : bf16 to vector<1x24x128xbf16>
    %8 = arith.select %6, %1, %7 : vector<1x24x128xbf16>
    %c1_i32 = arith.constant 1 : i32
    %9 = arith.cmpi slt, %arg1, %c1_i32 : i32
    %cst_11 = arith.constant 0.000000e+00 : bf16
    %10 = vector.broadcast %cst_11 : bf16 to vector<1x24x128xbf16>
    %11 = arith.select %9, %5, %10 : vector<1x24x128xbf16>
    %12 = tpu.concatenate %8, %3, %11 in 0 : vector<1x24x128xbf16>, vector<8x24x128xbf16>, vector<1x24x128xbf16> -> vector<10x24x128xbf16>
    %cst_12 = arith.constant 0.000000e+00 : f32
    %13 = vector.broadcast %cst_12 : f32 to vector<128x128xf32>
    %14 = vector.extract_strided_slice %12 {offsets = [0, 0, 0], sizes = [8, 16, 128], strides = [1, 1, 1]} : vector<10x24x128xbf16> to vector<8x16x128xbf16>
    %15 = vector.shape_cast %14 : vector<8x16x128xbf16> to vector<128x128xbf16>
    %c0_13 = arith.constant 0 : index
    %c0_14 = arith.constant 0 : index
    %c0_15 = arith.constant 0 : index
    %16 = vector.load %arg5[%c0_13, %c0_14, %c0_15] : memref<9x128x128xbf16, #tpu.memory_space<vmem>>, vector<1x128x128xbf16>
    %17 = vector.shape_cast %16 : vector<1x128x128xbf16> to vector<128x128xbf16>
    %cst_16 = arith.constant dense<0.000000e+00> : vector<128x128xf32>
    %18 = tpu.matmul %15, %17, %cst_16 {dimension_numbers = #tpu.dot_dimension_numbers<[1], [0], [0], [1], [0, 0, 1, 1], [], []>} : vector<128x128xbf16>, vector<128x128xbf16>, vector<128x128xf32> -> vector<128x128xf32>
    %19 = arith.addf %13, %18 : vector<128x128xf32>
    %20 = vector.extract_strided_slice %12 {offsets = [0, 1, 0], sizes = [8, 16, 128], strides = [1, 1, 1]} : vector<10x24x128xbf16> to vector<8x16x128xbf16>
    %21 = vector.shape_cast %20 : vector<8x16x128xbf16> to vector<128x128xbf16>
    %c1 = arith.constant 1 : index
    %c0_17 = arith.constant 0 : index
    %c0_18 = arith.constant 0 : index
    %22 = vector.load %arg5[%c1, %c0_17, %c0_18] : memref<9x128x128xbf16, #tpu.memory_space<vmem>>, vector<1x128x128xbf16>
    %23 = vector.shape_cast %22 : vector<1x128x128xbf16> to vector<128x128xbf16>
    %cst_19 = arith.constant dense<0.000000e+00> : vector<128x128xf32>
    %24 = tpu.matmul %21, %23, %cst_19 {dimension_numbers = #tpu.dot_dimension_numbers<[1], [0], [0], [1], [0, 0, 1, 1], [], []>} : vector<128x128xbf16>, vector<128x128xbf16>, vector<128x128xf32> -> vector<128x128xf32>
    %25 = arith.addf %19, %24 : vector<128x128xf32>
    %26 = vector.extract_strided_slice %12 {offsets = [0, 2, 0], sizes = [8, 16, 128], strides = [1, 1, 1]} : vector<10x24x128xbf16> to vector<8x16x128xbf16>
    %27 = vector.shape_cast %26 : vector<8x16x128xbf16> to vector<128x128xbf16>
    %c2 = arith.constant 2 : index
    %c0_20 = arith.constant 0 : index
    %c0_21 = arith.constant 0 : index
    %28 = vector.load %arg5[%c2, %c0_20, %c0_21] : memref<9x128x128xbf16, #tpu.memory_space<vmem>>, vector<1x128x128xbf16>
    %29 = vector.shape_cast %28 : vector<1x128x128xbf16> to vector<128x128xbf16>
    %cst_22 = arith.constant dense<0.000000e+00> : vector<128x128xf32>
    %30 = tpu.matmul %27, %29, %cst_22 {dimension_numbers = #tpu.dot_dimension_numbers<[1], [0], [0], [1], [0, 0, 1, 1], [], []>} : vector<128x128xbf16>, vector<128x128xbf16>, vector<128x128xf32> -> vector<128x128xf32>
    %31 = arith.addf %25, %30 : vector<128x128xf32>
    %32 = vector.extract_strided_slice %12 {offsets = [1, 0, 0], sizes = [8, 16, 128], strides = [1, 1, 1]} : vector<10x24x128xbf16> to vector<8x16x128xbf16>
    %33 = vector.shape_cast %32 : vector<8x16x128xbf16> to vector<128x128xbf16>
    %c3 = arith.constant 3 : index
    %c0_23 = arith.constant 0 : index
    %c0_24 = arith.constant 0 : index
    %34 = vector.load %arg5[%c3, %c0_23, %c0_24] : memref<9x128x128xbf16, #tpu.memory_space<vmem>>, vector<1x128x128xbf16>
    %35 = vector.shape_cast %34 : vector<1x128x128xbf16> to vector<128x128xbf16>
    %cst_25 = arith.constant dense<0.000000e+00> : vector<128x128xf32>
    %36 = tpu.matmul %33, %35, %cst_25 {dimension_numbers = #tpu.dot_dimension_numbers<[1], [0], [0], [1], [0, 0, 1, 1], [], []>} : vector<128x128xbf16>, vector<128x128xbf16>, vector<128x128xf32> -> vector<128x128xf32>
    %37 = arith.addf %31, %36 : vector<128x128xf32>
    %38 = vector.extract_strided_slice %12 {offsets = [1, 1, 0], sizes = [8, 16, 128], strides = [1, 1, 1]} : vector<10x24x128xbf16> to vector<8x16x128xbf16>
    %39 = vector.shape_cast %38 : vector<8x16x128xbf16> to vector<128x128xbf16>
    %c4 = arith.constant 4 : index
    %c0_26 = arith.constant 0 : index
    %c0_27 = arith.constant 0 : index
    %40 = vector.load %arg5[%c4, %c0_26, %c0_27] : memref<9x128x128xbf16, #tpu.memory_space<vmem>>, vector<1x128x128xbf16>
    %41 = vector.shape_cast %40 : vector<1x128x128xbf16> to vector<128x128xbf16>
    %cst_28 = arith.constant dense<0.000000e+00> : vector<128x128xf32>
    %42 = tpu.matmul %39, %41, %cst_28 {dimension_numbers = #tpu.dot_dimension_numbers<[1], [0], [0], [1], [0, 0, 1, 1], [], []>} : vector<128x128xbf16>, vector<128x128xbf16>, vector<128x128xf32> -> vector<128x128xf32>
    %43 = arith.addf %37, %42 : vector<128x128xf32>
    %44 = vector.extract_strided_slice %12 {offsets = [1, 2, 0], sizes = [8, 16, 128], strides = [1, 1, 1]} : vector<10x24x128xbf16> to vector<8x16x128xbf16>
    %45 = vector.shape_cast %44 : vector<8x16x128xbf16> to vector<128x128xbf16>
    %c5 = arith.constant 5 : index
    %c0_29 = arith.constant 0 : index
    %c0_30 = arith.constant 0 : index
    %46 = vector.load %arg5[%c5, %c0_29, %c0_30] : memref<9x128x128xbf16, #tpu.memory_space<vmem>>, vector<1x128x128xbf16>
    %47 = vector.shape_cast %46 : vector<1x128x128xbf16> to vector<128x128xbf16>
    %cst_31 = arith.constant dense<0.000000e+00> : vector<128x128xf32>
    %48 = tpu.matmul %45, %47, %cst_31 {dimension_numbers = #tpu.dot_dimension_numbers<[1], [0], [0], [1], [0, 0, 1, 1], [], []>} : vector<128x128xbf16>, vector<128x128xbf16>, vector<128x128xf32> -> vector<128x128xf32>
    %49 = arith.addf %43, %48 : vector<128x128xf32>
    %50 = vector.extract_strided_slice %12 {offsets = [2, 0, 0], sizes = [8, 16, 128], strides = [1, 1, 1]} : vector<10x24x128xbf16> to vector<8x16x128xbf16>
    %51 = vector.shape_cast %50 : vector<8x16x128xbf16> to vector<128x128xbf16>
    %c6 = arith.constant 6 : index
    %c0_32 = arith.constant 0 : index
    %c0_33 = arith.constant 0 : index
    %52 = vector.load %arg5[%c6, %c0_32, %c0_33] : memref<9x128x128xbf16, #tpu.memory_space<vmem>>, vector<1x128x128xbf16>
    %53 = vector.shape_cast %52 : vector<1x128x128xbf16> to vector<128x128xbf16>
    %cst_34 = arith.constant dense<0.000000e+00> : vector<128x128xf32>
    %54 = tpu.matmul %51, %53, %cst_34 {dimension_numbers = #tpu.dot_dimension_numbers<[1], [0], [0], [1], [0, 0, 1, 1], [], []>} : vector<128x128xbf16>, vector<128x128xbf16>, vector<128x128xf32> -> vector<128x128xf32>
    %55 = arith.addf %49, %54 : vector<128x128xf32>
    %56 = vector.extract_strided_slice %12 {offsets = [2, 1, 0], sizes = [8, 16, 128], strides = [1, 1, 1]} : vector<10x24x128xbf16> to vector<8x16x128xbf16>
    %57 = vector.shape_cast %56 : vector<8x16x128xbf16> to vector<128x128xbf16>
    %c7 = arith.constant 7 : index
    %c0_35 = arith.constant 0 : index
    %c0_36 = arith.constant 0 : index
    %58 = vector.load %arg5[%c7, %c0_35, %c0_36] : memref<9x128x128xbf16, #tpu.memory_space<vmem>>, vector<1x128x128xbf16>
    %59 = vector.shape_cast %58 : vector<1x128x128xbf16> to vector<128x128xbf16>
    %cst_37 = arith.constant dense<0.000000e+00> : vector<128x128xf32>
    %60 = tpu.matmul %57, %59, %cst_37 {dimension_numbers = #tpu.dot_dimension_numbers<[1], [0], [0], [1], [0, 0, 1, 1], [], []>} : vector<128x128xbf16>, vector<128x128xbf16>, vector<128x128xf32> -> vector<128x128xf32>
    %61 = arith.addf %55, %60 : vector<128x128xf32>
    %62 = vector.extract_strided_slice %12 {offsets = [2, 2, 0], sizes = [8, 16, 128], strides = [1, 1, 1]} : vector<10x24x128xbf16> to vector<8x16x128xbf16>
    %63 = vector.shape_cast %62 : vector<8x16x128xbf16> to vector<128x128xbf16>
    %c8 = arith.constant 8 : index
    %c0_38 = arith.constant 0 : index
    %c0_39 = arith.constant 0 : index
    %64 = vector.load %arg5[%c8, %c0_38, %c0_39] : memref<9x128x128xbf16, #tpu.memory_space<vmem>>, vector<1x128x128xbf16>
    %65 = vector.shape_cast %64 : vector<1x128x128xbf16> to vector<128x128xbf16>
    %cst_40 = arith.constant dense<0.000000e+00> : vector<128x128xf32>
    %66 = tpu.matmul %63, %65, %cst_40 {dimension_numbers = #tpu.dot_dimension_numbers<[1], [0], [0], [1], [0, 0, 1, 1], [], []>} : vector<128x128xbf16>, vector<128x128xbf16>, vector<128x128xf32> -> vector<128x128xf32>
    %67 = arith.addf %61, %66 : vector<128x128xf32>
    %c0_41 = arith.constant 0 : index
    %c0_42 = arith.constant 0 : index
    %68 = vector.load %arg6[%c0_41, %c0_42] : memref<1x128xf32, #tpu.memory_space<vmem>>, vector<1x128xf32>
    %69 = vector.broadcast %68 : vector<1x128xf32> to vector<128x128xf32>
    %70 = arith.addf %67, %69 : vector<128x128xf32>
    %cst_43 = arith.constant dense<0.000000e+00> : vector<128xf32>
    %71 = vector.multi_reduction <add>, %70, %cst_43 [0] : vector<128x128xf32> to vector<128xf32>
    %72 = vector.shape_cast %71 : vector<128xf32> to vector<1x128xf32>
    %c0_44 = arith.constant 0 : index
    %c0_45 = arith.constant 0 : index
    %c0_46 = arith.constant 0 : index
    %73 = vector.load %arg8[%c0_44, %c0_45, %c0_46] : memref<1x2x128xf32, #tpu.memory_space<vmem>>, vector<1x1x128xf32>
    %74 = vector.shape_cast %73 : vector<1x1x128xf32> to vector<1x128xf32>
    %75 = vector.shape_cast %72 : vector<1x128xf32> to vector<1x1x128xf32>
    tpu.vector_store %arg8[%c0_44, %c0_45, %c0_46], %75 {strides = array<i32>} : memref<1x2x128xf32, #tpu.memory_space<vmem>>, vector<1x1x128xf32>,
    %76 = arith.mulf %70, %70 : vector<128x128xf32>
    %cst_47 = arith.constant dense<0.000000e+00> : vector<128xf32>
    %77 = vector.multi_reduction <add>, %76, %cst_47 [0] : vector<128x128xf32> to vector<128xf32>
    %78 = vector.shape_cast %77 : vector<128xf32> to vector<1x128xf32>
    %c0_48 = arith.constant 0 : index
    %c1_49 = arith.constant 1 : index
    %c0_50 = arith.constant 0 : index
    %79 = vector.load %arg8[%c0_48, %c1_49, %c0_50] : memref<1x2x128xf32, #tpu.memory_space<vmem>>, vector<1x1x128xf32>
    %80 = vector.shape_cast %79 : vector<1x1x128xf32> to vector<1x128xf32>
    %81 = vector.shape_cast %78 : vector<1x128xf32> to vector<1x1x128xf32>
    tpu.vector_store %arg8[%c0_48, %c1_49, %c0_50], %81 {strides = array<i32>} : memref<1x2x128xf32, #tpu.memory_space<vmem>>, vector<1x1x128xf32>,
    %82 = vector.shape_cast %70 : vector<128x128xf32> to vector<8x16x128xf32>
    %83 = arith.truncf %82 : vector<8x16x128xf32> to vector<8x16x128xbf16>
    %cst_51 = arith.constant 0.000000e+00 : bf16
    %84 = vector.broadcast %cst_51 : bf16 to vector<8x1x128xbf16>
    %cst_52 = arith.constant 0.000000e+00 : bf16
    %85 = vector.broadcast %cst_52 : bf16 to vector<8x7x128xbf16>
    %86 = tpu.concatenate %84, %83, %85 in 1 : vector<8x1x128xbf16>, vector<8x16x128xbf16>, vector<8x7x128xbf16> -> vector<8x24x128xbf16>
    %c0_53 = arith.constant 0 : index
    %c0_54 = arith.constant 0 : index
    %c0_55 = arith.constant 0 : index
    %c0_56 = arith.constant 0 : index
    %87 = vector.load %arg7[%c0_53, %c0_54, %c0_55, %c0_56] : memref<1x8x24x128xbf16, #tpu.memory_space<vmem>>, vector<1x8x24x128xbf16>
    %88 = vector.shape_cast %87 : vector<1x8x24x128xbf16> to vector<8x24x128xbf16>
    %89 = vector.shape_cast %86 : vector<8x24x128xbf16> to vector<1x8x24x128xbf16>
    tpu.vector_store %arg7[%c0_53, %c0_54, %c0_55, %c0_56], %89 {strides = array<i32>} : memref<1x8x24x128xbf16, #tpu.memory_space<vmem>>, vector<1x8x24x128xbf16>,
    return
  }
  func.func @transform_0(%arg0: i32, %arg1: i32) -> (i32, i32, i32, i32) {
    %c8_i32 = arith.constant 8 : i32
    %0 = arith.muli %arg1, %c8_i32 : i32
    %c1_i32 = arith.constant 1 : i32
    %1 = arith.subi %0, %c1_i32 : i32
    %c0_i32 = arith.constant 0 : i32
    %2 = arith.maxsi %1, %c0_i32 : i32
    %c0_i32_0 = arith.constant 0 : i32
    %c0_i32_1 = arith.constant 0 : i32
    %c0_i32_2 = arith.constant 0 : i32
    return %arg0, %2, %c0_i32_0, %c0_i32_1 : i32, i32, i32, i32
  }
  func.func @transform_1(%arg0: i32, %arg1: i32) -> (i32, i32, i32, i32) {
    %c0_i32 = arith.constant 0 : i32
    %c0_i32_0 = arith.constant 0 : i32
    %c0_i32_1 = arith.constant 0 : i32
    return %arg0, %arg1, %c0_i32, %c0_i32_0 : i32, i32, i32, i32
  }
  func.func @transform_2(%arg0: i32, %arg1: i32) -> (i32, i32, i32, i32) {
    %c8_i32 = arith.constant 8 : i32
    %0 = arith.muli %arg1, %c8_i32 : i32
    %c8_i32_0 = arith.constant 8 : i32
    %1 = arith.addi %0, %c8_i32_0 : i32
    %c15_i32 = arith.constant 15 : i32
    %2 = arith.minsi %1, %c15_i32 : i32
    %c0_i32 = arith.constant 0 : i32
    %c0_i32_1 = arith.constant 0 : i32
    %c0_i32_2 = arith.constant 0 : i32
    return %arg0, %2, %c0_i32, %c0_i32_1 : i32, i32, i32, i32
  }
  func.func @transform_3(%arg0: i32, %arg1: i32) -> (i32, i32, i32) {
    %c0_i32 = arith.constant 0 : i32
    %c0_i32_0 = arith.constant 0 : i32
    %c0_i32_1 = arith.constant 0 : i32
    %c0_i32_2 = arith.constant 0 : i32
    return %c0_i32, %c0_i32_0, %c0_i32_1 : i32, i32, i32
  }
  func.func @transform_4(%arg0: i32, %arg1: i32) -> (i32, i32) {
    %c0_i32 = arith.constant 0 : i32
    %c0_i32_0 = arith.constant 0 : i32
    %c0_i32_1 = arith.constant 0 : i32
    return %c0_i32, %c0_i32_0 : i32, i32
  }
  func.func @transform_5(%arg0: i32, %arg1: i32) -> (i32, i32, i32, i32) {
    %c0_i32 = arith.constant 0 : i32
    %c0_i32_0 = arith.constant 0 : i32
    %c0_i32_1 = arith.constant 0 : i32
    return %arg0, %arg1, %c0_i32, %c0_i32_0 : i32, i32, i32, i32
  }
  func.func @transform_6(%arg0: i32, %arg1: i32) -> (i32, i32, i32) {
    %c2_i32 = arith.constant 2 : i32
    %0 = arith.muli %arg0, %c2_i32 : i32
    %1 = arith.addi %0, %arg1 : i32
    %c0_i32 = arith.constant 0 : i32
    %c0_i32_0 = arith.constant 0 : i32
    %c0_i32_1 = arith.constant 0 : i32
    return %1, %c0_i32, %c0_i32_0 : i32, i32, i32
  }
}

</mosaic_0001>

<bundles_post_ra>
// kernel: tpu_custom_call.1
= control target key start
LH: loop header
LB: loop body
LE: loop exit
PB: predicated region body
PF: predicated region fallthrough
CT: control target
= control target key end

     0   :  { %s5427_s0 = inlined_call_operand.hbm [shape: bf16[2,16,24,128], index: 0, kind: input, shape index: {}]   ;;  %s5428_s1 = inlined_call_operand.hbm [shape: bf16[2,16,24,128], index: 1, kind: input, shape index: {}]   ;;  %s5429_s2 = inlined_call_operand.hbm [shape: bf16[2,16,24,128], index: 2, kind: input, shape index: {}]   ;;  %s5430_s3 = inlined_call_operand.hbm [shape: bf16[9,128,128], index: 3, kind: input, shape index: {}]   ;;  %s5431_s4 = inlined_call_operand.vmem [shape: f32[1,128], index: 4, kind: input, shape index: {}]   ;;  %s5432_s5 = inlined_call_operand.hbm [shape: bf16[2,16,24,128], index: 5, kind: output, shape index: {0}]   ;;  %s5433_s6 = inlined_call_operand.hbm [shape: f32[4,2,128], index: 6, kind: output, shape index: {1}]  }
   0x1   :  { %5461 = sst [smem:[#allocation46_spill]] %s5427_s0 }
   0x2   :  { %5462 = sst [smem:[#allocation47_spill]] %s5428_s1 }
   0x3   :  { %5463 = sst [smem:[#allocation48_spill]] %s5429_s2 }
   0x4   :  { %5464 = sst [smem:[#allocation49_spill]] %s5430_s3 }
   0x5   :  { %5465 = sst [smem:[#allocation50_spill]] %s5431_s4 }
   0x6   :  { %5466 = sst [smem:[#allocation51_spill]] %s5432_s5 }
   0x7   :  { %5467 = sst [smem:[#allocation52_spill]] %s5433_s6 }
   0x8   :  { %12 = vsyncpa [#allocation3], 0 }
   0x9   :  { %14 = vsyncpa [#allocation3 + $0x1], 0 }
   0xa   :  { %15 = vsyncpa [#allocation6], 0 }
   0xb   :  { %17 = vsyncpa [#allocation6 + $0x1], 0 }
   0xc   :  { %18 = vsyncpa [#allocation9], 0 }
   0xd   :  { %19 = vsyncpa [#allocation4], 0 }
   0xe   :  { %21 = vsyncpa [#allocation4 + $0x1], 0 }
   0xf   :  { %22 = vsyncpa [#allocation12], 0 }
  0x10   :  { %24 = vsyncpa [#allocation12 + $0x1], 0  ;;  %s4292_s21 = smov 0   ;;  %s4294_s22 = smov 0  }
  0x11   :  { %s4296_s23 = smov 0   ;;  %s4298_s24 = smov 0  }
  0x12   :  { %s4300_s25 = smov 0   ;;  %s4302_s26 = smov 0  }
  0x13   :  { %s4304_s27 = smov 0   ;;  %s4306_s28 = smov 0  }
  0x14   :  { %s4308_s29 = smov 0   ;;  %s4310_s30 = smov 0  }
  0x15   :  { %s4312_s7 = smov 0   ;;  %s4314_s8 = smov 0  }
  0x16   :  { %s4316_s9 = smov 0   ;;  %s4318_s10 = smov 0  }
  0x17   :  { %s4320_s11 = smov 0   ;;  %s4322_s12 = smov 0  }
  0x18   :  { %s4324_s13 = smov 0  }
  0x19 LB: > { %5468 = sst [smem:[#allocation19_spill]] %s4181_s21  ;;  %s3035_s14 = sadd.s32 4294967294, %s4245_s13   ;;  %s4245_s13 = sphi %s4324_s13, %s30_s13   ;;  %s4241_s12 = sphi %s4322_s12, %s5584_s12   ;;  %s4237_s11 = sphi %s4320_s11, %s5571_s11   ;;  %s4233_s10 = sphi %s4318_s10, %s5583_s10   ;;  %s4229_s9 = sphi %s4316_s9, %s5569_s9   ;;  %s4225_s8 = sphi %s4314_s8, %s5568_s8   ;;  %s4221_s7 = sphi %s4312_s7, %s5582_s7   ;;  %s4217_s30 = sphi %s4310_s30, %s5566_s30   ;;  %s4213_s29 = sphi %s4308_s29, %s5581_s29   ;;  %s4209_s28 = sphi %s4306_s28, %s5580_s28   ;;  %s4205_s27 = sphi %s4304_s27, %s5579_s27   ;;  %s4201_s26 = sphi %s4302_s26, %s5578_s26   ;;  %s4197_s25 = sphi %s4300_s25, %s5562_s25   ;;  %s4193_s24 = sphi %s4298_s24, %s5577_s24   ;;  %s4189_s23 = sphi %s4296_s23, %s5576_s23   ;;  %s4185_s22 = sphi %s4294_s22, %s5574_s22   ;;  %s4181_s21 = sphi %s4292_s21, %s5573_s21  }
  0x1a   : > { %5469 = sst [smem:[#allocation20_spill]] %s4189_s23  ;;  %s39_s15 = sadd.s32 1, %s4237_s11 }
  0x1b   : > { %5470 = sst [smem:[#allocation21_spill]] %s4193_s24  ;;  %p40_p0 = scmp.ge.s32.totalorder %s39_s15, 2 }
  0x1c   : > { %5471 = sst [smem:[#allocation22_spill]] %s4197_s25  ;;  %s42_s16 = sadd.s32 1, %s4241_s12 }
  0x1d   : > { %5472 = sst [smem:[#allocation23_spill]] %s4201_s26  ;;  %p5445_p1 = scmp.eq.s32.totalorder %s4245_s13, 0 }
  0x1e   : > { %5473 = sst [smem:[#allocation24_spill]] %s4205_s27  ;;  %s87_s17 = sadd.s32 1, %s4213_s29 }
  0x1f   : > { %5474 = sst [smem:[#allocation25_spill]] %s4213_s29  ;;  %s5586_s15 = smov (%p40_p0, %s39_s15), 0 }
  0x20   : > { %5475 = sst [smem:[#allocation26_spill]] %s4217_s30  ;;  %s5588_s16 = smov (!%p40_p0, %s42_s16), %s4241_s12 }
  0x21   : > { %5476 = sst [smem:[#allocation27_spill]] %s4221_s7  ;;  %s83_s18 = ssub.s32 %s4237_s11, %s5586_s15 }
  0x22   : > { %5477 = sst [smem:[#allocation28_spill]] %s4225_s8  ;;  %p94_p2 = scmp.ne.s32.totalorder %s4213_s29, %s4209_s28 }
  0x23   : > { %5478 = sst [smem:[#allocation29_spill]] %s4229_s9  ;;  %p44_p3 = scmp.ge.s32.totalorder %s5588_s16, 2 }
  0x24   : > { %5479 = sst [smem:[#allocation30_spill]] %s4233_s10  ;;  %p100_p4 = scmp.ne.s32.totalorder %s4209_s28, %s4205_s27 }
  0x25   : > { %5480 = sst [smem:[#allocation31_spill]] %s4237_s11  ;;  %p4396_p5 = por %p94_p2, %p5445_p1 }
  0x26   : > { %5481 = sst [smem:[#allocation32_spill]] %s4241_s12  ;;  %p4400_p6 = scmp.eq.s32.totalorder %s3035_s14, 3 }
  0x27   : > { %5482 = sst [smem:[#allocation33_spill]] %s5586_s15  ;;  %s5590_s16 = smov (%p44_p3, %s5588_s16), 0 }
  0x28   : > { %5485 = sst [smem:[#allocation34_spill]] %s5590_s16  ;;  %p4411_p7 = por %p4400_p6, %p100_p4 }
  0x29   : > { %s3042_s5 = sshll.u32 %s4241_s12, 1  ;;  %s4418_s14 = ssub.s32 %s4241_s12, %s5590_s16 }
  0x2a   : > { %s5486_s6 = scalar_select %p4411_p7, 1, 0 }
  0x2b   : > { %s217_s10 = sadd.s32 %s4237_s11, %s3042_s5  ;;  %s84_s4 = sor.u32 %s83_s18, %s4418_s14 }
  0x2c   : > { %5487 = sst [smem:[#allocation35_spill]] %s5486_s6  ;;  %s3043_s9 = sshll.u32 %s5590_s16, 1 }
  0x2d   : > { %p85_p8 = scmp.eq.s32.totalorder %s84_s4, 0  ;;  %s219_s2 = sadd.s32 %s3043_s9, %s5586_s15 }
  0x2e   : > { %s220_s24 = ssub.s32 %s217_s10, %s219_s2  ;;  %p5444_p10 = scmp.lt.s32.totalorder %s4245_s13, 4 }
  0x2f   : > { %s4425_s25 = scalar_select %p85_p8, %s4213_s29, %s87_s17  }
  0x30   : > { %p4427_p9 = scmp.eq.s32.totalorder %s220_s24, 0  ;;  %s4433_s6 = smul.u32 48, %s4241_s12 }
  0x31   : > { %5488 = sst [smem:[#allocation36_spill]] %s4425_s25  ;;  %s303_s0 = sand.u32 1, %s4245_s13  }
  0x32   : > { %s305_s30 = sand.u32 1, %s4213_s29   ;;  %p4441_p11 = pnand %p5444_p10, %p4396_p5 }
  0x33   : > { %s3654_s7 = smul.u32 96, %s305_s30  ;;  %s5491_s1 = sld [smem:[#allocation47_spill]] }
  0x34   : > { %s3655_s2 = smul.u32 24, %s4237_s11  ;;  %s4450_s12 = scalar_lea.sflag [#allocation6], %s303_s0 }
  0x35   : > { %s307_s24 = scalar_lea.vmem [#allocation5], %s3654_s7  ;;  %p3927_p12 = pneg %p4441_p11 }
  0x36   : > { %s314_s4 = sadd.s32 %s3655_s2, %s4433_s6  ;;  %s317_s9 = sshll.u32 %s307_s24, 4  ;;  %s318_s9 = int_to_ptr.vmem [resolvable:$true] %s317_s9 }
  0x37   : > { %s3052_s10 = sshll.u32 %s314_s4, 6  ;;  %s3938_s30 = scalar_lea.vmem %s318_s9, 1536 }
  0x38   : > { %p3939_p13 = scmp.ne.s32.totalorder %s318_s9, %s3938_s30  ;;  %s4247_s19 = smov [#allocation5]  }
  0x39   : > { %s316_s16 = scalar_lea.hbm %s5491_s1, %s3052_s10  ;;  %s3943_s25 = sshll.u32 %s4247_s19, 4  ;;  %s3944_s25 = int_to_ptr.vmem [resolvable:$false] %s3943_s25 }
  0x3a   : > { %p3941_p0 = pnand %p3939_p13, %p3927_p12  ;;  %s3945_s2 = scalar_lea.vmem %s3944_s25, 3072 }
  0x3b   : > { %p3946_p5 = scmp.lt.s32.totalorder %s318_s9, %s3944_s25  ;;  %p3947_p8 = scmp.lt.s32.totalorder %s3945_s2, %s3938_s30 }
  0x3c   : > { %p3942_p3 = pneg %p3941_p0 }
  0x3d   : > { %p3948_p10 = por %p3947_p8, %p3946_p5 }
  0x3f   : > { %p3949_p1 = pnand %p3948_p10, %p3942_p3 }
  0x41   : > { %3952 = shalt.err (!%p3949_p1)
}
  0x42   : > { %s5449_s7 = smov 64   ;;  %s5451_s0 = smov 4  }
  0x43   : > { %3689 = dma.hbm_to_vmem [thread:$0]  (!%p4441_p11), %s316_s16, 1536, %s318_s9, %s4450_s12, %s5449_s7, %s5449_s7, %s5451_s0  }
  0x44   : > { %s4461_s25 = sadd.s32 4294967295, %s4245_s13   ;;  %s223_s4 = sadd.s32 1, %s4189_s23 }
  0x45   : > { %p5460_p1 = scmp.eq.s32.totalorder %s4461_s25, 0  ;;  %p204_p10 = scmp.eq.s32.totalorder %s4461_s25, 3 }
  0x46   : > { %s4469_s24 = scalar_select %p4427_p9, %s4189_s23, %s223_s4  }
  0x47   : > { %p4476_p12 = por %p100_p4, %p5460_p1  ;;  %p4483_p11 = por %p204_p10, %p94_p2 }
  0x48   : > { %5492 = sst [smem:[#allocation37_spill]] %s4469_s24  ;;  %p233_p13 = scmp.ne.s32.totalorder %s4189_s23, %s4185_s22 }
  0x49   : > { %s5494_s16 = scalar_select %p4483_p11, 1, 0 }
  0x4a   : > { %p239_p0 = scmp.ne.s32.totalorder %s4185_s22, %s4181_s21  ;;  %p3044_p3 = scmp.ge.s32.totalorder %s4245_s13, 1 }
  0x4b   : > { %p247_p5 = scmp.lt.s32.totalorder %s4245_s13, 5  ;;  %p4493_p8 = por %p233_p13, %p204_p10 }
  0x4c   : > { %p4499_p9 = por %p239_p0, %p4400_p6  ;;  %s4250_s17 = smov [#allocation8]  }
  0x4d   : > { %s5495_s9 = scalar_select %p4493_p8, 1, 0 }
  0x4e   : > { %s5496_s26 = scalar_select %p4499_p9, 1, 0 }
  0x4f   : > { %p4503_p4 = pnand %p3044_p3, %p247_p5  ;;  %s259_s18 = sshll.u32 %s4250_s17, 4  ;;  %s260_s18 = int_to_ptr.vmem [resolvable:$true] %s259_s18 }
  0x50   : > { %5497 = sst [smem:[#allocation38_spill]] %s5496_s26  ;;  %s3964_s30 = scalar_lea.vmem %s260_s18, 9216 }
  0x51   : > { %p3679_p2 = pneg %p4503_p4  ;;  %p3965_p7 = scmp.ne.s32.totalorder %s260_s18, %s3964_s30 }
  0x52   : > { %p3972_p0 = scmp.lt.s32.totalorder %s260_s18, %s260_s18  ;;  %p3973_p11 = scmp.lt.s32.totalorder %s3964_s30, %s3964_s30 }
  0x53   : > { %p3680_p10 = pnand %p3679_p2, %p5460_p1 }
  0x54   : > { %p3974_p9 = por %p3973_p11, %p3972_p0 }
  0x55   : > { %p3955_p13 = pneg %p3680_p10 }
  0x57   : > { %p3967_p8 = pnand %p3965_p7, %p3955_p13 }
  0x59   : > { %p3968_p6 = pneg %p3967_p8 }
  0x5b   : > { %p3975_p3 = pnand %p3974_p9, %p3968_p6 }
  0x5d   : > { %3978 = shalt.err (!%p3975_p3)
}
  0x5e   : > { %s5499_s3 = sld [smem:[#allocation49_spill]]  ;;  %s3036_s17 = sshll.u32 %s4237_s11, 3 }
  0x5f   : > { %s5500_s2 = sld [smem:[#allocation27_spill]]  ;;  %s3038_s30 = sshll.u32 %s5586_s15, 3 }
  0x60   : > { %s5501_s4 = sld [smem:[#allocation26_spill]]  ;;  %s3037_s1 = sadd.s32 4294967295, %s3036_s17 }
  0x61   : > { %s3039_s29 = sadd.s32 4294967295, %s3038_s30  ;;  %p48_p7 = scmp.gt.s32.totalorder %s3037_s1, 0 }
  0x62   : > { %p52_p11 = scmp.gt.s32.totalorder %s3039_s29, 0  ;;  %s59_s20 = sadd.s32 1, %s4225_s8 }
  0x63   : > { %s5592_s1 = smov (!%p48_p7, %s3037_s1), 0  ;;  %p5502_p8 = scmp.eq.s32.totalorder %s4245_s13, 0 }
  0x64   : > { %3682 = dma.hbm_to_vmem [thread:$0]  (!%p3680_p10), %s5499_s3, 9216, %s260_s18, [#allocation9], %s5449_s7, %s5449_s7, %s5451_s0  }
  0x65   : > { %p66_p5 = scmp.ne.s32.totalorder %s4225_s8, %s5500_s2  ;;  %s5594_s29 = smov (!%p52_p11, %s3039_s29), 0 }
  0x66   : > { %p72_p2 = scmp.ne.s32.totalorder %s5500_s2, %s5501_s4  ;;  %s55_s18 = ssub.s32 %s5592_s1, %s5594_s29 }
  0x67   : > { %p4524_p9 = por %p5502_p8, %p66_p5  ;;  %s4530_s7 = sadd.s32 8, %s3036_s17 }
  0x68   : > { %s56_s0 = sor.u32 %s55_s18, %s4418_s14  ;;  %p4535_p10 = por %p5460_p1, %p72_p2 }
  0x69   : > { %p57_p13 = scmp.eq.s32.totalorder %s56_s0, 0  ;;  %p112_p6 = scmp.lt.s32.totalorder %s4530_s7, 15 }
  0x6a   : > { %s4540_s15 = sadd.s32 8, %s3038_s30  ;;  %s276_s11 = sand.u32 1, %s4225_s8  }
  0x6b   : > { %s4544_s24 = scalar_select %p57_p13, %s4225_s8, %s59_s20  }
  0x6c   : > { %p116_p0 = scmp.lt.s32.totalorder %s4540_s15, 15  ;;  %s3651_s2 = smul.u32 12, %s276_s11 }
  0x6d   : > { %5505 = sst [smem:[#allocation39_spill]] %s4544_s24  ;;  %p5506_p3 = scmp.lt.s32.totalorder %s4245_s13, 4 }
  0x6e   : > { %s3652_s4 = smul.u32 3, %s5592_s1  ;;  %s280_s18 = scalar_lea.vmem [#allocation2], %s3651_s2 }
  0x6f   : > { %p4551_p7 = pnand %p5506_p3, %p4524_p9  ;;  %s293_s0 = sshll.u32 %s280_s18, 4  ;;  %s294_s0 = int_to_ptr.vmem [resolvable:$true] %s293_s0 }
  0x70   : > { %s290_s17 = sadd.s32 %s4433_s6, %s3652_s4  ;;  %s5508_s21 = sld [smem:[#allocation46_spill]] }
  0x71   : > { %s3049_s23 = sshll.u32 %s290_s17, 6  ;;  %s277_s24 = scalar_lea.sflag [#allocation3], %s276_s11 }
  0x72   : > { %p3981_p11 = pneg %p4551_p7  ;;  %s3992_s19 = scalar_lea.vmem %s294_s0, 192 }
  0x73   : > { %p3993_p5 = scmp.ne.s32.totalorder %s294_s0, %s3992_s19  ;;  %s4251_s8 = smov [#allocation2]  }
  0x74   : > { %s3997_s27 = sshll.u32 %s4251_s8, 4  ;;  %s3998_s27 = int_to_ptr.vmem [resolvable:$false] %s3997_s27 }
  0x75   : > { %p3995_p8 = pnand %p3993_p5, %p3981_p11  ;;  %s3999_s1 = scalar_lea.vmem %s3998_s27, 384 }
  0x76   : > { %s292_s20 = scalar_lea.hbm %s5508_s21, %s3049_s23  ;;  %p4000_p2 = scmp.lt.s32.totalorder %s294_s0, %s3998_s27 }
  0x77   : > { %p3996_p9 = pneg %p3995_p8  ;;  %p4001_p13 = scmp.lt.s32.totalorder %s3999_s1, %s3992_s19 }
  0x79   : > { %p4002_p3 = por %p4001_p13, %p4000_p2 }
  0x7b   : > { %p4003_p1 = pnand %p4002_p3, %p3996_p9 }
  0x7d   : > { %4006 = shalt.err (!%p4003_p1)
}
  0x7e   : > { %s5509_s26 = smov 4   ;;  %s5510_s21 = smov 64  }
  0x7f   : > { %s5511_s23 = sld [smem:[#allocation23_spill]]  ;;  %s5596_s7 = smov (!%p112_p6, %s4530_s7), 15 }
  0x80   : > { %s5512_s11 = sld [smem:[#allocation22_spill]]  ;;  %s5598_s15 = smov (!%p116_p0, %s4540_s15), 15 }
  0x81   : > { %s5513_s8 = sld [smem:[#allocation21_spill]]  ;;  %s119_s2 = ssub.s32 %s5596_s7, %s5598_s15 }
  0x82   : > { %3686 = dma.hbm_to_vmem [thread:$0]  (!%p4551_p7), %s292_s20, 192, %s294_s0, %s277_s24, %s5510_s21, %s5510_s21, %s5509_s26  }
  0x83   : > { %s120_s29 = sor.u32 %s119_s2, %s4418_s14  ;;  %p5514_p5 = scmp.eq.s32.totalorder %s4245_s13, 0 }
  0x84   : > { %p121_p9 = scmp.eq.s32.totalorder %s120_s29, 0  ;;  %p5515_p2 = scmp.eq.s32.totalorder %s4461_s25, 0 }
  0x85   : > { %s123_s27 = sadd.s32 1, %s5511_s23  ;;  %s329_s17 = sand.u32 1, %s5511_s23  }
  0x86   : > { %p130_p1 = scmp.ne.s32.totalorder %s5511_s23, %s5512_s11  ;;  %s3658_s24 = smul.u32 3, %s5596_s7 }
  0x87   : > { %p136_p11 = scmp.ne.s32.totalorder %s5512_s11, %s5513_s8  ;;  %s5600_s23 = smov (!%p121_p9, %s5511_s23), %s123_s27 }
  0x88   : > { %p132_p8 = por %p130_p1, %p5514_p5  ;;  %s3657_s18 = smul.u32 12, %s329_s17 }
  0x89   : > { %p4582_p13 = por %p136_p11, %p5515_p2  ;;  %s341_s0 = sadd.s32 %s3658_s24, %s4433_s6 }
  0x8a   : > { %s3054_s30 = sshll.u32 %s341_s0, 6  ;;  %p5517_p6 = scmp.lt.s32.totalorder %s4245_s13, 4 }
  0x8b   : > { %s5519_s19 = sld [smem:[#allocation48_spill]]  ;;  %s331_s11 = scalar_lea.vmem [#allocation7], %s3657_s18 }
  0x8c   : > { %p4593_p0 = pnand %p5517_p6, %p132_p8  ;;  %s344_s8 = sshll.u32 %s331_s11, 4  ;;  %s345_s8 = int_to_ptr.vmem [resolvable:$true] %s344_s8 }
  0x8d   : > { %s4020_s7 = scalar_lea.vmem %s345_s8, 192  ;;  %s4252_s6 = smov [#allocation7]  }
  0x8e   : > { %p4009_p7 = pneg %p4593_p0  ;;  %p4021_p3 = scmp.ne.s32.totalorder %s345_s8, %s4020_s7 }
  0x8f   : > { %s4025_s27 = sshll.u32 %s4252_s6, 4  ;;  %s4026_s27 = int_to_ptr.vmem [resolvable:$false] %s4025_s27 }
  0x90   : > { %p4023_p1 = pnand %p4021_p3, %p4009_p7  ;;  %s4027_s2 = scalar_lea.vmem %s4026_s27, 384 }
  0x91   : > { %s343_s1 = scalar_lea.hbm %s5519_s19, %s3054_s30  ;;  %p4028_p5 = scmp.lt.s32.totalorder %s345_s8, %s4026_s27 }
  0x92   : > { %p4024_p11 = pneg %p4023_p1  ;;  %p4029_p8 = scmp.lt.s32.totalorder %s4027_s2, %s4020_s7 }
  0x94   : > { %p4030_p9 = por %p4029_p8, %p4028_p5 }
  0x96   : > { %p4031_p2 = pnand %p4030_p9, %p4024_p11 }
  0x98   : > { %4034 = shalt.err (!%p4031_p2)
}
  0x99   : > { %3692 = dma.hbm_to_vmem [thread:$0]  (!%p4593_p0), %s343_s1, 192, %s345_s8, %s4450_s12, %s5510_s21, %s5510_s21, %s5509_s26  }
  0x9a   : > { %356 = sbr.rel (%p4503_p4) target bundleno = 631 (0x277), region = 40 }
  0x9f   : > { %s5520_s29 = sld [smem:[#allocation27_spill]] }
  0xa5   : > { %s358_s17 = sand.u32 1, %s5520_s29  }
  0xa6   : > { %s3660_s24 = smul.u32 12, %s358_s17  ;;  %s359_s18 = scalar_lea.sflag [#allocation3], %s358_s17 }
  0xa8   : > { %s4611_s0 = scalar_lea.vmem [#allocation2], %s3660_s24 }
  0xa9   : > { %4156 = dma.done.wait (%p4535_p10), %s359_s18, 192  }
  0xaa   : > { %4158 = vsyncadd (%p4535_p10), %s359_s18, 4294967104  ;;  %s367_s12 = sand.u32 1, %s4461_s25   ;;  %s369_s26 = sand.u32 1, %s4209_s28  }
  0xab   : > { %s4621_s10 = smul.u32 96, %s369_s26  ;;  %s368_s21 = scalar_lea.sflag [#allocation6], %s367_s12 }
  0xad   : > { %s4624_s30 = scalar_lea.vmem [#allocation5], %s4621_s10 }
  0xae   : > { %4160 = dma.done.wait (%p4476_p12), %s368_s21, 1536  }
  0xaf   : > { %4162 = vsyncadd (%p4476_p12), %s368_s21, 4294965760  ;;  %s5521_s3 = sld [smem:[#allocation22_spill]] }
  0xb5   : > { %s378_s15 = sand.u32 1, %s5521_s3  }
  0xb6   : > { %s3662_s14 = smul.u32 12, %s378_s15 }
  0xb8   : > { %s4631_s20 = scalar_lea.vmem [#allocation7], %s3662_s14 }
  0xb9   : > { %4164 = dma.done.wait (%p4582_p13), %s368_s21, 192  }
  0xba   : > { %4166 = vsyncadd (%p4582_p13), %s368_s21, 4294967104  ;;  %p5522_p4 = scmp.eq.s32.totalorder %s4461_s25, 0 }
  0xbc   : > { %4168 = dma.done.wait (%p5522_p4), [#allocation9], 9216   ;;  %p5523_p10 = pmov %p5522_p4 }
  0xbd   : > { %s5524_s19 = sld [smem:[#allocation29_spill]]  ;;  %v3845_v0 = vld [vmem:[#allocation8 + $0x78] sm:$0xff]   ;;  %v3847_v2 = vld [vmem:[#allocation8 + $0x70] sm:$0xff]   ;;  %v3849_v4 = vld [vmem:[#allocation8 + $0x68] sm:$0xff]   ;;  %vm501_vm0 = vsmask.f32 3328 }
  0xbe   : > { %4170 = vsyncadd (%p5523_p10), [#allocation9], 4294958080  ;;  %v3846_v1 = vld [vmem:[#allocation8 + $0x38] sm:$0xff]   ;;  %3347 = vmatprep.subr.bf16.mxu0 %v3845_v0  ;;  %v3848_v3 = vld [vmem:[#allocation8 + $0x30] sm:$0xff]   ;;  %vm502_vm1 = vsmask.f32 7440 }
  0xbf   : > { %3379 = vmatprep.subr.bf16.mxu1 %v3846_v1  ;;  %3348 = vmatpush3.bf16.msra.mxu0 %v3845_v0  ;;  %v3850_v5 = vld [vmem:[#allocation8 + $0x28] sm:$0xff]   ;;  %v3851_v6 = vld [vmem:[#allocation8 + $0x60] sm:$0xff]   ;;  %v3853_v9 = vld [vmem:[#allocation8 + $0x58] sm:$0xff]   ;;  %vm1091_vm4 = vcmask 1042432   ;;  %vm1092_vm5 = vcmask 1046532   ;;  %vm2683_vm8 = vcmask 1040384  }
  0xc0   : > { %3380 = vmatpush3.bf16.msra.mxu1 %v3846_v1  ;;  %3349 = vmatprep.subr.bf16.mxu0 %v3847_v2  ;;  %v3852_v7 = vld [vmem:[#allocation8 + $0x20] sm:$0xff]   ;;  %v3854_v10 = vld [vmem:[#allocation8 + $0x18] sm:$0xff]   ;;  %v3855_v11 = vld [vmem:[#allocation8 + $0x50] sm:$0xff]   ;;  %vm2684_vm9 = vsmask.f32 256  ;;  %s5540_s11 = sld [smem:[#allocation50_spill]] }
  0xc1   : > { %3381 = vmatprep.subr.bf16.mxu1 %v3848_v3  ;;  %v441_v12 = vld [vmem:[%s4611_s0] sm:$0xf]  ;;  %v442_v13 = vld [vmem:[%s4611_s0 + $0x4] sm:$0xf]  ;;  %v443_v14 = vld [vmem:[%s4611_s0 + $0x8] sm:$0xf] }
  0xc2   : > { %v3856_v15 = vld [vmem:[#allocation8 + $0x10] sm:$0xff]   ;;  %v4652_v19 = vld [vmem:[%s4624_s30] sm:$0xf]  ;;  %v4659_v24 = vld [vmem:[%s4624_s30 + $0x4] sm:$0xf]  ;;  %s5194_s8 = scalar_lea.vmem [#allocation10], %s4621_s10 }
  0xc3   : > { %p471_p12 = scmp.gt.s32.totalorder %s5524_s19, 0  ;;  %3350 = vmatpush3.bf16.msra.mxu0 %v3847_v2  ;;  %v3857_v25 = vld [vmem:[#allocation8 + $0x48] sm:$0xff]   ;;  %v4665_v29 = vld [vmem:[%s4624_s30 + $0x8] sm:$0xf]  ;;  %v529_v30 = vshrl.u32 %v4652_v19, 16  ;;  %v532_v37 = vshll.u32 %v4652_v19, 16  ;;  %vm4672_vm3 = vmor %vm501_vm0, %vm502_vm1 }
  0xc4   : > { %3382 = vmatpush3.bf16.msra.mxu1 %v3848_v3  ;;  %3351 = vmatprep.subr.bf16.mxu0 %v3849_v4  ;;  %v3858_v26 = vld [vmem:[#allocation8 + $0x8] sm:$0xff]   ;;  %v538_v38 = vshll.u32 %v4659_v24, 16  ;;  %v542_v42 = vshrl.u32 %v4659_v24, 16  ;;  %v548_v43 = vshll.u32 %v4665_v29, 16  ;;  %v3859_v44 = vld [vmem:[#allocation8 + $0x40] sm:$0xff]   ;;  %v3862_v58 = vld [vmem:[#allocation8 + $0xb8] sm:$0xff]  }
  0xc5   : > { %s472_s5 = scalar_select %p471_p12, 1, 0  ;;  %3383 = vmatprep.subr.bf16.mxu1 %v3850_v5  ;;  %v531_v36 = vrot.slane %v529_v30, 4  ;;  %v3860_v45 = vld [vmem:[#allocation8] sm:$0xff]   ;;  %v534_v46 = vrot.slane %v532_v37, 5  ;;  %v3863_v0 = vld [vmem:[#allocation8 + $0xf8] sm:$0xff]   ;;  %vm4836_vm6 = vmor %vm1091_vm4, %vm1092_vm5 }
  0xc6   : > { %v540_v47 = vrot.slane %v538_v38, 5  ;;  %v544_v51 = vrot.slane %v542_v42, 4  ;;  %v550_v53 = vrot.slane %v548_v43, 5  ;;  %v4685_v59 = vld [vmem:[%s4624_s30 + $0xc] sm:$0xf]  ;;  %v3868_v43 = vld [vmem:[#allocation8 + $0xa8] sm:$0xff]   ;;  %vm5182_vm10 = vmand %vm2683_vm8, %vm2684_vm9 }
  0xc7   : > { %3352 = vmatpush3.bf16.msra.mxu0 %v3849_v4  ;;  %v473_v8 = vstv %s472_s5  ;;  %v535_v52 = vor.u32 %v534_v46, %v531_v36  ;;  %v4688_v60 = vld [vmem:[%s4624_s30 + $0x10] sm:$0xf]  ;;  %v4691_v61 = vld [vmem:[%s4624_s30 + $0x14] sm:$0xf]  ;;  %v553_v1 = vshrl.u32 %v4685_v59, 16  ;;  %v556_v2 = vshll.u32 %v4685_v59, 16 }
  0xc8   : > { %3384 = vmatpush3.bf16.msra.mxu1 %v3850_v5  ;;  %3353 = vmatprep.subr.bf16.mxu0 %v3851_v6  ;;  %vm474_vm2 = vcmp.eq.s32.totalorder %v473_v8, 1  ;;  %v545_v57 = vor.u32 %v544_v51, %v540_v47  ;;  %v4696_v3 = vld [vmem:[%s4624_s30 + $0x18] sm:$0xf]  ;;  %v562_v5 = vshll.u32 %v4688_v60, 16  ;;  %v4702_v8 = vld [vmem:[%s4624_s30 + $0x1c] sm:$0xf] }
  0xc9   : > { %3385 = vmatprep.subr.bf16.mxu1 %v3852_v7  ;;  %v4645_v16 = vsel %vm474_vm2, %v441_v12, 0  ;;  %v4647_v17 = vsel %vm474_vm2, %v442_v13, 0  ;;  %v4649_v18 = vsel %vm474_vm2, %v443_v14, 0  ;;  %v536_v63 = vrot.slane %v535_v52, 4  ;;  %v4711_v13 = vld [vmem:[%s4624_s30 + $0x20] sm:$0xf] }
  0xca   : > { %v505_v20 = vshrl.u32 %v4645_v16, 16  ;;  %v508_v21 = vshll.u32 %v4645_v16, 16  ;;  %v514_v22 = vshll.u32 %v4647_v17, 16  ;;  %v518_v23 = vshrl.u32 %v4647_v17, 16  ;;  %v4743_v52 = vld [vmem:[%s4624_s30 + $0x2c] sm:$0xf] }
  0xcb   : > { %3354 = vmatpush3.bf16.msra.mxu0 %v3851_v6  ;;  %v524_v27 = vshll.u32 %v4649_v18, 16  ;;  %v3074_v28 = vcombine.low %v4645_v16, %v4647_v17  ;;  %v1099_v50 = vrot.slane %v4649_v18, 5  ;;  %v3090_v54 = vrot.slane %v4645_v16, 9  ;;  %p478_p13 = scmp.lt.s32.totalorder %s5524_s19, 1  ;;  %s5546_s7 = sld [smem:[#allocation30_spill]] }
  0xcc   : > { %3386 = vmatpush3.bf16.msra.mxu1 %v3852_v7  ;;  %3355 = vmatprep.subr.bf16.mxu0 %v3853_v9  ;;  %v507_v31 = vrot.slane %v505_v20, 4  ;;  %v510_v32 = vrot.slane %v508_v21, 5  ;;  %v516_v33 = vrot.slane %v514_v22, 5  ;;  %v520_v34 = vrot.slane %v518_v23, 4  ;;  %s3663_s6 = smul.u32 24, %s5524_s19  ;;  %s2836_s29 = sshll.u32 %s5194_s8, 4  ;;  %s5291_s29 = int_to_ptr.vmem [resolvable:$true] %s2836_s29 }
  0xcd   : > { %3387 = vmatprep.subr.bf16.mxu1 %v3854_v10  ;;  %v526_v35 = vrot.slane %v524_v27, 5  ;;  %3395 = vmatprep.mubr.bf16.mxu1 %v3074_v28  ;;  %v546_v4 = vrot.slane %v545_v57, 4  ;;  %v566_v6 = vshrl.u32 %v4688_v60, 16  ;;  %v572_v7 = vshll.u32 %v4691_v61, 16  ;;  %v3864_v27 = vld [vmem:[#allocation8 + $0xb0] sm:$0xff]   ;;  %s5547_s0 = sld [smem:[#allocation51_spill]] }
  0xce   : > { %v511_v40 = vor.u32 %v510_v32, %v507_v31  ;;  %v521_v41 = vor.u32 %v520_v34, %v516_v33  ;;  %v558_v12 = vrot.slane %v556_v2, 5  ;;  %v586_v30 = vshll.u32 %v4702_v8, 16  ;;  %s479_s25 = scalar_select %p478_p13, 1, 0 }
  0xcf   : > { %3356 = vmatpush3.bf16.msra.mxu0 %v3853_v9  ;;  %v541_v9 = vsel %vm4672_vm3, %v536_v63, %v540_v47  ;;  %v551_v14 = vsel %vm4672_vm3, %v546_v4, %v550_v53  ;;  %v568_v20 = vrot.slane %v566_v6, 4  ;;  %v574_v21 = vrot.slane %v572_v7, 5  ;;  %v4735_v47 = vld [vmem:[%s4624_s30 + $0x24] sm:$0xf]  ;;  %v4760_v7 = vld [vmem:[%s4624_s30 + $0x38] sm:$0xf] }
  0xd0   : > { %3388 = vmatpush3.bf16.msra.mxu1 %v3854_v10  ;;  %3357 = vmatprep.subr.bf16.mxu0 %v3855_v11  ;;  %v512_v48 = vrot.slane %v511_v40, 4  ;;  %v522_v49 = vrot.slane %v521_v41, 4  ;;  %v4708_v10 = vcombine.low %v4652_v19, %v4659_v24  ;;  %v4715_v22 = vcombine.low %v541_v9, %v551_v14  ;;  %s5309_s10 = scalar_lea.sflag [#allocation4], %s369_s26  ;;  %s4035_s21 = scalar_lea.vmem %s5291_s29, 1536 }
  0xd1   : > { %3389 = vmatprep.subr.bf16.mxu1 %v3856_v15  ;;  %v590_v31 = vshrl.u32 %v4702_v8, 16  ;;  %v596_v32 = vshll.u32 %v4711_v13, 16  ;;  %v588_v40 = vrot.slane %v586_v30, 5  ;;  %v4732_v46 = vcombine.low %v4696_v3, %v4702_v8  ;;  %s3664_s27 = smul.u32 48, %s5546_s7  ;;  %p4036_p6 = scmp.ne.s32.totalorder %s5291_s29, %s4035_s21 }
  0xd2   : > { %v517_v55 = vsel %vm4672_vm3, %v512_v48, %v516_v33  ;;  %v527_v56 = vsel %vm4672_vm3, %v522_v49, %v526_v35  ;;  %v3865_v33 = vld [vmem:[#allocation8 + $0xf0] sm:$0xff]   ;;  %v4724_v35 = vcombine.low %v4685_v59, %v4688_v60  ;;  %v601_v53 = vshrl.u32 %v4735_v47, 16  ;;  %p5548_p0 = scmp.ne.s32.totalorder %s5494_s16, 0 }
  0xd3   : > { %3358 = vmatpush3.bf16.msra.mxu0 %v3855_v11  ;;  %v3058_v62 = vcombine.low %v517_v55, %v527_v56  ;;  %v555_v11 = vrot.slane %v553_v1, 4  ;;  %v592_v41 = vrot.slane %v590_v31, 4  ;;  %v598_v42 = vrot.slane %v596_v32, 5  ;;  %v4738_v48 = vld [vmem:[%s4624_s30 + $0x28] sm:$0xf]  ;;  %s5266_s2 = sadd.s32 %s3664_s27, %s3663_s6 }
  0xd4   : > { %3390 = vmatpush3.bf16.msra.mxu1 %v3856_v15  ;;  %3359 = vmatprep.subr.bf16.mxu0 %v3857_v25  ;;  %v564_v15 = vrot.slane %v562_v5, 5  ;;  %v604_v55 = vshll.u32 %v4735_v47, 16  ;;  %v4748_v56 = vld [vmem:[%s4624_s30 + $0x30] sm:$0xf]  ;;  %v610_v63 = vshll.u32 %v4738_v48, 16  ;;  %v603_v4 = vrot.slane %v601_v53, 4  ;;  %p4037_p7 = pnand %p4036_p6, %p5548_p0 }
  0xd5   : > { %3391 = vmatprep.subr.bf16.mxu1 %v3858_v26  ;;  %3363 = vmatprep.mubr.bf16.mxu0 %v3058_v62  ;;  %v559_v23 = vor.u32 %v558_v12, %v555_v11  ;;  %v593_v51 = vor.u32 %v592_v41, %v588_v40  ;;  %v3869_v62 = vld [vmem:[#allocation8 + $0xe8] sm:$0xff]   ;;  %v4756_v1 = vld [vmem:[%s4624_s30 + $0x34] sm:$0xf]  ;;  %v620_v6 = vshll.u32 %v4743_v52, 16  ;;  %v4767_v14 = vcombine.low %v4735_v47, %v4738_v48  ;;  %v4787_v53 = vld [vmem:[%s4624_s30 + $0x3c] sm:$0xf] }
  0xd6   : > { %v569_v28 = vor.u32 %v568_v20, %v564_v15  ;;  %v606_v5 = vrot.slane %v604_v55, 5  ;;  %v612_v11 = vrot.slane %v610_v63, 5  ;;  %v628_v30 = vshll.u32 %v4748_v56, 16  ;;  %v3874_v41 = vld [vmem:[#allocation8 + $0x98] sm:$0xff]   ;;  %s3198_s17 = sshll.u32 %s5266_s2, 6  ;;  %p4038_p3 = pneg %p4037_p7 }
  0xd7   : > { %3360 = vmatpush3.bf16.msra.mxu0 %v3857_v25  ;;  %v577_v25 = vshrl.u32 %v4696_v3, 16  ;;  %v560_v34 = vrot.slane %v559_v23, 4  ;;  %v594_v2 = vrot.slane %v593_v51, 4  ;;  %v625_v23 = vshrl.u32 %v4748_v56, 16  ;;  %v3875_v51 = vld [vmem:[#allocation8 + $0xd8] sm:$0xff]   ;;  %s5298_s12 = scalar_lea.hbm %s5547_s0, %s3198_s17 }
  0xd8   : > { %3392 = vmatpush3.bf16.msra.mxu1 %v3858_v26  ;;  %3361 = vmatprep.subr.bf16.mxu0 %v3859_v44  ;;  %v580_v26 = vshll.u32 %v4696_v3, 16  ;;  %v570_v38 = vrot.slane %v569_v28, 4  ;;  %v607_v20 = vor.u32 %v606_v5, %v603_v4  ;;  %v634_v31 = vshll.u32 %v4756_v1, 16 }
  0xd9   : > { %3393 = vmatprep.subr.bf16.mxu1 %v3860_v45  ;;  %v579_v36 = vrot.slane %v577_v25, 4  ;;  %v649_v63 = vshrl.u32 %v4787_v53, 16  ;;  %v1110_v18 = vrot.slane %v4688_v60, 5 }
  0xda   : > { %v582_v37 = vrot.slane %v580_v26, 5  ;;  %v575_v49 = vsel %vm4672_vm3, %v570_v38, %v574_v21  ;;  %v622_v21 = vrot.slane %v620_v6, 5  ;;  %v3870_v26 = vld [vmem:[#allocation8 + $0xa0] sm:$0xff]   ;;  %v608_v32 = vrot.slane %v607_v20, 4 }
  0xdb   : > { %3362 = vmatpush3.bf16.msra.mxu0 %v3859_v44  ;;  %v565_v44 = vsel %vm4672_vm3, %v560_v34, %v564_v15  ;;  %v599_v15 = vsel %vm4672_vm3, %v594_v2, %v598_v42  ;;  %v638_v34 = vshrl.u32 %v4756_v1, 16  ;;  %v630_v38 = vrot.slane %v628_v30, 5  ;;  %v3876_v30 = vld [vmem:[#allocation8 + $0x90] sm:$0xff]  }
  0xdc   : > { %3394 = vmatpush3.bf16.msra.mxu1 %v3860_v45  ;;  %3411 = vmatprep.subr.bf16.mxu0 %v3862_v58  ;;  %v583_v45 = vor.u32 %v582_v37, %v579_v36  ;;  %v4750_v57 = vcombine.low %v565_v44, %v575_v49  ;;  %v644_v36 = vshll.u32 %v4760_v7, 16  ;;  %v613_v42 = vsel %vm4672_vm3, %v608_v32, %v612_v11 }
  0xdd   : > { %3443 = vmatprep.subr.bf16.mxu1 %v3863_v0  ;;  %v640_v44 = vrot.slane %v638_v34, 4  ;;  %v4784_v49 = vcombine.low %v4748_v56, %v4756_v1 }
  0xde   : > { %3364 = vmatmul.mubr.bf16.vlgmr.msra.gmra.mxu0 %v4715_v22 }
  0xdf   : > { %3396 = vmatmul.mubr.bf16.vlgmr.msra.gmra.mxu1 %v4708_v10  ;;  %3412 = vmatpush3.bf16.msra.mxu0 %v3862_v58  ;;  %v584_v58 = vrot.slane %v583_v45, 4  ;;  %v646_v45 = vrot.slane %v644_v36, 5 }
  0xe0   : > { %3444 = vmatpush3.bf16.msra.mxu1 %v3863_v0  ;;  %3413 = vmatprep.subr.bf16.mxu0 %v3864_v27  ;;  %v614_v0 = vshrl.u32 %v4738_v48, 16 }
  0xe1   : > { %3445 = vmatprep.subr.bf16.mxu1 %v3865_v33  ;;  %3399 = vmatprep.mubr.bf16.mxu1 %v4724_v35  ;;  %v589_v9 = vsel %vm4672_vm3, %v584_v58, %v588_v40  ;;  %v636_v40 = vrot.slane %v634_v31, 5  ;;  %v4792_v58 = vld [vmem:[%s4624_s30 + $0x40] sm:$0xf] }
  0xe2   : > { %3367 = vmatprep.mubr.bf16.mxu0 %v4750_v57  ;;  %v616_v12 = vrot.slane %v614_v0, 4  ;;  %v4772_v25 = vcombine.low %v589_v9, %v599_v15  ;;  %v652_v0 = vshll.u32 %v4787_v53, 16  ;;  %v658_v5 = vshll.u32 %v4792_v58, 16  ;;  %v4805_v9 = vld [vmem:[%s4624_s30 + $0x48] sm:$0xf] }
  0xe3   : > { %3414 = vmatpush3.bf16.msra.mxu0 %v3864_v27  ;;  %v3871_v27 = vld [vmem:[#allocation8 + $0xe0] sm:$0xff]   ;;  %v641_v4 = vor.u32 %v640_v44, %v636_v40  ;;  %v662_v6 = vshrl.u32 %v4792_v58, 16  ;;  %v651_v15 = vrot.slane %v649_v63, 4  ;;  %v676_v44 = vshll.u32 %v4805_v9, 16 }
  0xe4   : > { %3446 = vmatpush3.bf16.msra.mxu1 %v3865_v33  ;;  %3415 = vmatprep.subr.bf16.mxu0 %v3868_v43  ;;  %v617_v28 = vor.u32 %v616_v12, %v612_v11  ;;  %v627_v33 = vrot.slane %v625_v23, 4  ;;  %v4808_v11 = vld [vmem:[%s4624_s30 + $0x4c] sm:$0xf]  ;;  %v654_v20 = vrot.slane %v652_v0, 5  ;;  %v4812_v23 = vld [vmem:[%s4624_s30 + $0x50] sm:$0xf] }
  0xe5   : > { %3447 = vmatprep.subr.bf16.mxu1 %v3869_v62  ;;  %v660_v31 = vrot.slane %v658_v5, 5  ;;  %v664_v32 = vrot.slane %v662_v6, 4  ;;  %v686_v0 = vshrl.u32 %v4808_v11, 16 }
  0xe6   : > { %3368 = vmatmul.mubr.bf16.gmra.mxu0 %v4772_v25  ;;  %v618_v37 = vrot.slane %v617_v28, 4  ;;  %v631_v55 = vor.u32 %v630_v38, %v627_v33  ;;  %v642_v28 = vrot.slane %v641_v4, 4  ;;  %v4816_v33 = vcombine.low %v4787_v53, %v4792_v58  ;;  %v3880_v4 = vld [vmem:[#allocation8 + $0x88] sm:$0xff]  }
  0xe7   : > { %3400 = vmatmul.mubr.bf16.gmra.mxu1 %v4732_v46  ;;  %3416 = vmatpush3.bf16.msra.mxu0 %v3868_v43  ;;  %v655_v36 = vor.u32 %v654_v20, %v651_v15  ;;  %v673_v38 = vshrl.u32 %v4805_v9, 16  ;;  %v688_v20 = vrot.slane %v686_v0, 4 }
  0xe8   : > { %3448 = vmatpush3.bf16.msra.mxu1 %v3869_v62  ;;  %3417 = vmatprep.subr.bf16.mxu0 %v3870_v26  ;;  %v623_v43 = vsel %vm4672_vm3, %v618_v37, %v622_v21  ;;  %v4795_v62 = vld [vmem:[%s4624_s30 + $0x44] sm:$0xf]  ;;  %v632_v12 = vrot.slane %v631_v55, 4 }
  0xe9   : > { %3449 = vmatprep.subr.bf16.mxu1 %v3871_v27  ;;  %v4799_v2 = vcombine.low %v613_v42, %v623_v43  ;;  %3403 = vmatprep.mubr.bf16.mxu1 %v4767_v14  ;;  %v668_v21 = vshll.u32 %v4795_v62, 16  ;;  %v665_v42 = vor.u32 %v664_v32, %v660_v31  ;;  %v682_v43 = vshll.u32 %v4808_v11, 16 }
  0xea   : > { %v637_v34 = vsel %vm4672_vm3, %v632_v12, %v636_v40  ;;  %v656_v40 = vrot.slane %v655_v36, 4  ;;  %v675_v63 = vrot.slane %v673_v38, 4  ;;  %v692_v12 = vshll.u32 %v4812_v23, 16 }
  0xeb   : > { %3418 = vmatpush3.bf16.msra.mxu0 %v3870_v26  ;;  %3371 = vmatprep.mubr.bf16.mxu0 %v4799_v2  ;;  %v670_v37 = vrot.slane %v668_v21, 5  ;;  %v647_v26 = vsel %vm4672_vm3, %v642_v28, %v646_v45  ;;  %v666_v5 = vrot.slane %v665_v42, 4  ;;  %v678_v45 = vrot.slane %v676_v44, 5  ;;  %v3882_v42 = vld [vmem:[#allocation8 + $0x80] sm:$0xff]  }
  0xec   : > { %3450 = vmatpush3.bf16.msra.mxu1 %v3871_v27  ;;  %3419 = vmatprep.subr.bf16.mxu0 %v3874_v41  ;;  %v3877_v27 = vld [vmem:[#allocation8 + $0xd0] sm:$0xff]   ;;  %v4826_v55 = vcombine.low %v637_v34, %v647_v26  ;;  %v684_v6 = vrot.slane %v682_v43, 5  ;;  %v661_v15 = vsel %vm4672_vm3, %v656_v40, %v660_v31  ;;  %v4846_v32 = vcombine.low %v4805_v9, %v4808_v11  ;;  %v3881_v31 = vld [vmem:[#allocation8 + $0xc8] sm:$0xff]   ;;  %v3883_v40 = vld [vmem:[#allocation8 + $0xc0] sm:$0xff]  }
  0xed   : > { %3451 = vmatprep.subr.bf16.mxu1 %v3875_v51  ;;  %v679_v28 = vor.u32 %v678_v45, %v675_v63  ;;  %v694_v38 = vrot.slane %v692_v12, 5  ;;  %v1103_v44 = vrot.slane %v4659_v24, 5  ;;  %v1117_v12 = vrot.slane %v4702_v8, 5 }
  0xee   : > { %3372 = vmatmul.mubr.bf16.gmra.mxu0 %v4826_v55  ;;  %v689_v36 = vor.u32 %v688_v20, %v684_v6 }
  0xef   : > { %3404 = vmatmul.mubr.bf16.gmra.mxu1 %v4784_v49  ;;  %3420 = vmatpush3.bf16.msra.mxu0 %v3874_v41  ;;  %v1096_v41 = vrot.slane %v4647_v17, 5  ;;  %v680_v17 = vrot.slane %v679_v28, 4  ;;  %v1105_v0 = vrot.slane %v1103_v44, 4  ;;  %v1120_v28 = vrot.slane %v4711_v13, 5 }
  0xf0   : > { %3452 = vmatpush3.bf16.msra.mxu1 %v3875_v51  ;;  %3421 = vmatprep.subr.bf16.mxu0 %v3876_v30  ;;  %v671_v51 = vsel %vm4672_vm3, %v666_v5, %v670_v37  ;;  %v690_v43 = vrot.slane %v689_v36, 4  ;;  %v3884_v5 = vld [vmem:[#allocation8 + $0x138] sm:$0xff]  }
  0xf1   : > { %3453 = vmatprep.subr.bf16.mxu1 %v3877_v27  ;;  %3407 = vmatprep.mubr.bf16.mxu1 %v4816_v33  ;;  %v4848_v34 = vcombine.low %v661_v15, %v671_v51  ;;  %v1098_v26 = vrot.slane %v1096_v41, 4  ;;  %v1097_v37 = vsel %vm4836_vm6, %v3090_v54, %v1096_v41  ;;  %v685_v16 = vsel %vm4672_vm3, %v680_v17, %v684_v6 }
  0xf2   : > { %v3091_v54 = vrot.slane %v4652_v19, 9  ;;  %v695_v24 = vsel %vm4672_vm3, %v690_v43, %v694_v38  ;;  %v3885_v19 = vld [vmem:[#allocation8 + $0x178] sm:$0xff]   ;;  %v1112_v6 = vrot.slane %v1110_v18, 4  ;;  %v1124_v15 = vrot.slane %v4738_v48, 5 }
  0xf3   : > { %3422 = vmatpush3.bf16.msra.mxu0 %v3876_v30  ;;  %3375 = vmatprep.mubr.bf16.mxu0 %v4848_v34  ;;  %v1100_v30 = vsel %vm4836_vm6, %v1098_v26, %v1099_v50  ;;  %v4868_v45 = vcombine.low %v685_v16, %v695_v24  ;;  %v1113_v50 = vrot.slane %v4691_v61, 5  ;;  %v3093_v41 = vrot.slane %v4696_v3, 9  ;;  %v3889_v26 = vld [vmem:[#allocation8 + $0x168] sm:$0xff]  }
  0xf4   : > { %3454 = vmatpush3.bf16.msra.mxu1 %v3877_v27  ;;  %3423 = vmatprep.subr.bf16.mxu0 %v3880_v4  ;;  %v1106_v27 = vrot.slane %v4665_v29, 5  ;;  %v3098_v63 = vcombine.low %v1097_v37, %v1100_v30  ;;  %v3092_v29 = vrot.slane %v4685_v59, 9  ;;  %v1104_v60 = vsel %vm4836_vm6, %v3091_v54, %v1103_v44  ;;  %v3891_v44 = vld [vmem:[#allocation8 + $0x160] sm:$0xff]  }
  0xf5   : > { %3455 = vmatprep.subr.bf16.mxu1 %v3881_v31  ;;  %v1114_v61 = vsel %vm4836_vm6, %v1112_v6, %v1113_v50  ;;  %v1119_v51 = vrot.slane %v1117_v12, 4  ;;  %v3094_v48 = vrot.slane %v4735_v47, 9  ;;  %v1126_v36 = vrot.slane %v1124_v15, 4  ;;  %v3888_v47 = vld [vmem:[#allocation8 + $0x128] sm:$0xff]   ;;  %v3894_v50 = vld [vmem:[#allocation8 + $0x110] sm:$0xff]  }
  0xf6   : > { %3376 = vmatmul.mubr.bf16.gmra.mxu0 %v4868_v45  ;;  %v1111_v59 = vsel %vm4836_vm6, %v3092_v29, %v1110_v18  ;;  %v1127_v38 = vrot.slane %v4743_v52, 5  ;;  %v1118_v3 = vsel %vm4836_vm6, %v3093_v41, %v1117_v12  ;;  %v1131_v17 = vrot.slane %v4756_v1, 5  ;;  %v3895_v18 = vld [vmem:[#allocation8 + $0x150] sm:$0xff]   ;;  %v4931_v6 = vld [vmem:[%s4624_s30 + $0x54] sm:$0xf] }
  0xf7   : > { %3408 = vmatmul.mubr.bf16.gmra.mxu1 %v4846_v32  ;;  %3424 = vmatpush3.bf16.msra.mxu0 %v3880_v4  ;;  %v1107_v4 = vsel %vm4836_vm6, %v1105_v0, %v1106_v27  ;;  %v4888_v8 = vcombine.low %v1111_v59, %v1114_v61  ;;  %v1121_v13 = vsel %vm4836_vm6, %v1119_v51, %v1120_v28  ;;  %v1138_v37 = vrot.slane %v4792_v58, 5  ;;  %v4938_v12 = vld [vmem:[%s4624_s30 + $0x58] sm:$0xf]  ;;  %v3898_v59 = vld [vmem:[#allocation8 + $0x148] sm:$0xff]   ;;  %v3902_v28 = vld [vmem:[#allocation8 + $0x1f8] sm:$0xff]  }
  0xf8   : > { %3456 = vmatpush3.bf16.msra.mxu1 %v3881_v31  ;;  %3425 = vmatprep.subr.bf16.mxu0 %v3882_v42  ;;  %v4884_v20 = vcombine.low %v1104_v60, %v1107_v4  ;;  %v3886_v31 = vld [vmem:[#allocation8 + $0x130] sm:$0xff]   ;;  %v1125_v52 = vsel %vm4836_vm6, %v3094_v48, %v1124_v15  ;;  %v4906_v43 = vcombine.low %v1118_v3, %v1121_v13  ;;  %v3095_v30 = vrot.slane %v4748_v56, 9  ;;  %v3897_v15 = vld [vmem:[#allocation8 + $0x108] sm:$0xff]   ;;  %v3899_v51 = vld [vmem:[#allocation8 + $0x100] sm:$0xff]  }
  0xf9   : > { %3457 = vmatprep.subr.bf16.mxu1 %v3883_v40  ;;  %3459 = vmatprep.mubr.bf16.mxu1 %v4708_v10  ;;  %v3887_v10 = vld [vmem:[#allocation8 + $0x170] sm:$0xff]   ;;  %v1134_v1 = vrot.slane %v4760_v7, 5  ;;  %v1133_v16 = vrot.slane %v1131_v17, 4  ;;  %v3096_v54 = vrot.slane %v4787_v53, 9  ;;  %v1140_v58 = vrot.slane %v1138_v37, 4  ;;  %v3905_v13 = vld [vmem:[#allocation8 + $0x1a8] sm:$0xff]  }
  0xfa   : > { %3427 = vmatprep.mubr.bf16.mxu0 %v3098_v63  ;;  %v1141_v24 = vrot.slane %v4795_v62, 5  ;;  %v3893_v63 = vld [vmem:[#allocation8 + $0x158] sm:$0xff]   ;;  %v1132_v56 = vsel %vm4836_vm6, %v3095_v30, %v1131_v17  ;;  %v1145_v53 = vrot.slane %v4808_v11, 5  ;;  %v1148_v4 = vrot.slane %v4812_v23, 5  ;;  %v3904_v48 = vld [vmem:[#allocation8 + $0x1f0] sm:$0xff]   ;;  %v3908_v17 = vld [vmem:[#allocation8 + $0x1e0] sm:$0xff]  }
  0xfb   : > { %3426 = vmatpush3.bf16.msra.mxu0 %v3882_v42  ;;  %v1128_v42 = vsel %vm4836_vm6, %v1126_v36, %v1127_v38  ;;  %v1135_v7 = vsel %vm4836_vm6, %v1133_v16, %v1134_v1  ;;  %v3892_v62 = vld [vmem:[#allocation8 + $0x118] sm:$0xff]   ;;  %v1139_v0 = vsel %vm4836_vm6, %v3096_v54, %v1138_v37  ;;  %v4949_v23 = vcombine.low %v4931_v6, %v4938_v12  ;;  %v3903_v36 = vld [vmem:[#allocation8 + $0x1b0] sm:$0xff]  }
  0xfc   : > { %3458 = vmatpush3.bf16.msra.mxu1 %v3883_v40  ;;  %3475 = vmatprep.subr.bf16.mxu0 %v3884_v5  ;;  %v3890_v40 = vld [vmem:[#allocation8 + $0x120] sm:$0xff]   ;;  %v4911_v27 = vcombine.low %v1125_v52, %v1128_v42  ;;  %v4927_v29 = vcombine.low %v1132_v56, %v1135_v7  ;;  %v1147_v60 = vrot.slane %v1145_v53, 4  ;;  %v1545_v38 = vshrl.u32 %v4931_v6, 16  ;;  %v3910_v1 = vld [vmem:[#allocation8 + $0x1d8] sm:$0xff]  }
  0xfd   : > { %3507 = vmatprep.subr.bf16.mxu1 %v3885_v19  ;;  %v1554_v3 = vshll.u32 %v4938_v12, 16  ;;  %v1753_v30 = vrot.slane %v4938_v12, 5 }
  0xfe   : > { %3428 = vmatmul.mubr.bf16.vlgmr.msra.gmra.mxu0 %v4884_v20  ;;  %v1149_v61 = vsel %vm4836_vm6, %v1147_v60, %v1148_v4 }
  0xff   : > { %3460 = vmatmul.mubr.bf16.vlgmr.msra.gmra.mxu1 %v4724_v35  ;;  %3476 = vmatpush3.bf16.msra.mxu0 %v3884_v5  ;;  %v1142_v5 = vsel %vm4836_vm6, %v1140_v58, %v1141_v24  ;;  %v1556_v42 = vrot.slane %v1554_v3, 5  ;;  %v3909_v24 = vld [vmem:[#allocation8 + $0x198] sm:$0xff]   ;;  %v1755_v56 = vrot.slane %v1753_v30, 4  ;;  %v3919_v3 = vld [vmem:[#allocation8 + $0x228] sm:$0xff]  }
 0x100   : > { %3508 = vmatpush3.bf16.msra.mxu1 %v3885_v19  ;;  %3463 = vmatprep.mubr.bf16.mxu1 %v4732_v46  ;;  %v3097_v19 = vrot.slane %v4805_v9, 9  ;;  %v4934_v11 = vcombine.low %v1139_v0, %v1142_v5 }
 0x101   : > { %3509 = vmatprep.subr.bf16.mxu1 %v3887_v10  ;;  %3431 = vmatprep.mubr.bf16.mxu0 %v4888_v8 }
 0x102   : > { %3477 = vmatprep.subr.bf16.mxu0 %v3886_v31  ;;  %v1146_v9 = vsel %vm4836_vm6, %v3097_v19, %v1145_v53  ;;  %v3912_v53 = vld [vmem:[#allocation8 + $0x1d0] sm:$0xff]  }
 0x103   : > { %3478 = vmatpush3.bf16.msra.mxu0 %v3886_v31  ;;  %v4951_v41 = vcombine.low %v1146_v9, %v1149_v61  ;;  %v3901_v31 = vld [vmem:[#allocation8 + $0x1b8] sm:$0xff]   ;;  %v3916_v9 = vld [vmem:[#allocation8 + $0x1c0] sm:$0xff]  }
 0x104   : > { %3510 = vmatpush3.bf16.msra.mxu1 %v3887_v10  ;;  %3479 = vmatprep.subr.bf16.mxu0 %v3888_v47  ;;  %v3900_v10 = vld [vmem:[#allocation8 + $0x140] sm:$0xff]  }
 0x105   : > { %3511 = vmatprep.subr.bf16.mxu1 %v3889_v26 }
 0x106   : > { %3432 = vmatmul.mubr.bf16.gmra.mxu0 %v4906_v43 }
 0x107   : > { %3464 = vmatmul.mubr.bf16.gmra.mxu1 %v4767_v14  ;;  %3480 = vmatpush3.bf16.msra.mxu0 %v3888_v47  ;;  %v1547_v47 = vrot.slane %v1545_v38, 4 }
 0x108   : > { %3512 = vmatpush3.bf16.msra.mxu1 %v3889_v26  ;;  %3467 = vmatprep.mubr.bf16.mxu1 %v4784_v49  ;;  %v1558_v26 = vshrl.u32 %v4938_v12, 16 }
 0x109   : > { %3513 = vmatprep.subr.bf16.mxu1 %v3891_v44  ;;  %3435 = vmatprep.mubr.bf16.mxu0 %v4911_v27 }
 0x10a   : > { %3481 = vmatprep.subr.bf16.mxu0 %v3890_v40  ;;  %v1560_v37 = vrot.slane %v1558_v26, 4 }
 0x10b   : > { %3482 = vmatpush3.bf16.msra.mxu0 %v3890_v40  ;;  %v467_v40 = vld [vmem:[%s4624_s30 + $0x5c] sm:$0xf]  ;;  %s4253_s30 = smov [#allocation10]  }
 0x10c   : > { %3514 = vmatpush3.bf16.msra.mxu1 %v3891_v44  ;;  %3483 = vmatprep.subr.bf16.mxu0 %v3892_v62  ;;  %v3907_v44 = vld [vmem:[#allocation8 + $0x1a0] sm:$0xff]   ;;  %v1561_v54 = vor.u32 %v1560_v37, %v1556_v42  ;;  %v1564_v58 = vshll.u32 %v467_v40, 16  ;;  %v1756_v7 = vrot.slane %v467_v40, 5  ;;  %s4039_s3 = sshll.u32 %s4253_s30, 4  ;;  %s4040_s3 = int_to_ptr.vmem [resolvable:$false] %s4039_s3 }
 0x10d   : > { %3515 = vmatprep.subr.bf16.mxu1 %v3893_v63  ;;  %s4041_s15 = scalar_lea.vmem %s4040_s3, 3072  ;;  %p4042_p1 = scmp.lt.s32.totalorder %s5291_s29, %s4040_s3 }
 0x10e   : > { %3436 = vmatmul.mubr.bf16.gmra.mxu0 %v4927_v29  ;;  %v1562_v0 = vrot.slane %v1561_v54, 4  ;;  %v1566_v5 = vrot.slane %v1564_v58, 5  ;;  %v1757_v19 = vsel %vm4836_vm6, %v1755_v56, %v1756_v7  ;;  %p4043_p11 = scmp.lt.s32.totalorder %s4041_s15, %s4035_s21 }
 0x10f   : > { %3468 = vmatmul.mubr.bf16.gmra.mxu1 %v4816_v33  ;;  %3484 = vmatpush3.bf16.msra.mxu0 %v3892_v62 }
 0x110   : > { %3516 = vmatpush3.bf16.msra.mxu1 %v3893_v63  ;;  %3471 = vmatprep.mubr.bf16.mxu1 %v4846_v32  ;;  %v3132_v63 = vrot.slane %v4931_v6, 9  ;;  %v1567_v4 = vsel %vm4672_vm3, %v1562_v0, %v1566_v5  ;;  %p4044_p5 = por %p4043_p11, %p4042_p1 }
 0x111   : > { %3517 = vmatprep.subr.bf16.mxu1 %v3895_v18  ;;  %3439 = vmatprep.mubr.bf16.mxu0 %v4934_v11 }
 0x112   : > { %3485 = vmatprep.subr.bf16.mxu0 %v3894_v50  ;;  %p4045_p8 = pnand %p4044_p5, %p4038_p3 }
 0x113   : > { %3486 = vmatpush3.bf16.msra.mxu0 %v3894_v50  ;;  %v1754_v50 = vsel %vm4836_vm6, %v3132_v63, %v1753_v30 }
 0x114   : > { %3518 = vmatpush3.bf16.msra.mxu1 %v3895_v18  ;;  %3487 = vmatprep.subr.bf16.mxu0 %v3897_v15  ;;  %v3911_v18 = vld [vmem:[#allocation8 + $0x190] sm:$0xff]   ;;  %v4985_v12 = vcombine.low %v1754_v50, %v1757_v19 }
 0x115   : > { %3519 = vmatprep.subr.bf16.mxu1 %v3898_v59 }
 0x116   : > { %3440 = vmatmul.mubr.bf16.gmra.mxu0 %v4951_v41 }
 0x117   : > { %3472 = vmatmul.mubr.bf16.gmra.mxu1 %v4949_v23  ;;  %3488 = vmatpush3.bf16.msra.mxu0 %v3897_v15  ;;  %v480_v15 = vstv %s479_s25 }
 0x118   : > { %3520 = vmatpush3.bf16.msra.mxu1 %v3898_v59  ;;  %3523 = vmatprep.mubr.bf16.mxu1 %v4884_v20  ;;  %v3906_v20 = vld [vmem:[#allocation8 + $0x1e8] sm:$0xff]   ;;  %vm4996_vm7 = vcmp.eq.s32.totalorder %v480_v15, 1 }
 0x119   : > { %3521 = vmatprep.subr.bf16.mxu1 %v3900_v10  ;;  %3491 = vmatprep.mubr.bf16.mxu0 %v4715_v22  ;;  %v1548_v22 = vshll.u32 %v4931_v6, 16  ;;  %v3914_v6 = vld [vmem:[#allocation8 + $0x1c8] sm:$0xff]  }
 0x11a   : > { %3489 = vmatprep.subr.bf16.mxu0 %v3899_v51  ;;  %v3913_v59 = vld [vmem:[#allocation8 + $0x188] sm:$0xff]  }
 0x11b   : > { %3490 = vmatpush3.bf16.msra.mxu0 %v3899_v51  ;;  %v1550_v52 = vrot.slane %v1548_v22, 5  ;;  %v3917_v51 = vld [vmem:[#allocation8 + $0x238] sm:$0xff]  }
 0x11c   : > { %3522 = vmatpush3.bf16.msra.mxu1 %v3900_v10  ;;  %3539 = vmatprep.subr.bf16.mxu0 %v3901_v31  ;;  %v3915_v10 = vld [vmem:[#allocation8 + $0x180] sm:$0xff]  }
 0x11d   : > { %3571 = vmatprep.subr.bf16.mxu1 %v3902_v28  ;;  %v1551_v16 = vor.u32 %v1550_v52, %v1547_v47 }
 0x11e   : > { %3492 = vmatmul.mubr.bf16.vlgmr.msra.gmra.mxu0 %v4750_v57 }
 0x11f   : > { %3524 = vmatmul.mubr.bf16.vlgmr.msra.gmra.mxu1 %v4888_v8  ;;  %3540 = vmatpush3.bf16.msra.mxu0 %v3901_v31  ;;  %v1552_v62 = vrot.slane %v1551_v16, 4  ;;  %v469_v31 = vld [vmem:[%s4631_s20 + $0x4] sm:$0xf] }
 0x120   : > { %3572 = vmatpush3.bf16.msra.mxu1 %v3902_v28  ;;  %3527 = vmatprep.mubr.bf16.mxu1 %v4906_v43  ;;  %v468_v28 = vld [vmem:[%s4631_s20] sm:$0xf] }
 0x121   : > { %3573 = vmatprep.subr.bf16.mxu1 %v3904_v48  ;;  %3495 = vmatprep.mubr.bf16.mxu0 %v4772_v25  ;;  %v1557_v60 = vsel %vm4672_vm3, %v1552_v62, %v1556_v42  ;;  %v3920_v42 = vld [vmem:[#allocation8 + $0x220] sm:$0xff]  }
 0x122   : > { %3541 = vmatprep.subr.bf16.mxu0 %v3903_v36  ;;  %v4989_v61 = vcombine.low %v1557_v60, %v1567_v4 }
 0x123   : > { %3542 = vmatpush3.bf16.msra.mxu0 %v3903_v36  ;;  %v3918_v36 = vld [vmem:[#allocation8 + $0x230] sm:$0xff]  }
 0x124   : > { %3574 = vmatpush3.bf16.msra.mxu1 %v3904_v48  ;;  %3543 = vmatprep.subr.bf16.mxu0 %v3905_v13 }
 0x125   : > { %3575 = vmatprep.subr.bf16.mxu1 %v3906_v20 }
 0x126   : > { %3496 = vmatmul.mubr.bf16.gmra.mxu0 %v4799_v2 }
 0x127   : > { %3528 = vmatmul.mubr.bf16.gmra.mxu1 %v4911_v27  ;;  %3544 = vmatpush3.bf16.msra.mxu0 %v3905_v13  ;;  %v470_v13 = vld [vmem:[%s4631_s20 + $0x8] sm:$0xf] }
 0x128   : > { %3576 = vmatpush3.bf16.msra.mxu1 %v3906_v20  ;;  %3531 = vmatprep.mubr.bf16.mxu1 %v4927_v29  ;;  %v5007_v20 = vsel %vm4996_vm7, %v469_v31, 0  ;;  %v484_v37 = vsel %vm4996_vm7, %v470_v13, 0 }
 0x129   : > { %3577 = vmatprep.subr.bf16.mxu1 %v3908_v17  ;;  %3499 = vmatprep.mubr.bf16.mxu0 %v4826_v55  ;;  %v2138_v22 = vshrl.u32 %v5007_v20, 16  ;;  %v2134_v26 = vshll.u32 %v5007_v20, 16  ;;  %v2333_v39 = vrot.slane %v5007_v20, 5  ;;  %v2336_v58 = vrot.slane %v484_v37, 5 }
 0x12a   : > { %3545 = vmatprep.subr.bf16.mxu0 %v3907_v44 }
 0x12b   : > { %3546 = vmatpush3.bf16.msra.mxu0 %v3907_v44  ;;  %v2136_v47 = vrot.slane %v2134_v26, 5  ;;  %v2140_v52 = vrot.slane %v2138_v22, 4  ;;  %v2144_v44 = vshll.u32 %v484_v37, 16 }
 0x12c   : > { %3578 = vmatpush3.bf16.msra.mxu1 %v3908_v17  ;;  %3547 = vmatprep.subr.bf16.mxu0 %v3909_v24 }
 0x12d   : > { %3579 = vmatprep.subr.bf16.mxu1 %v3910_v1 }
 0x12e   : > { %3500 = vmatmul.mubr.bf16.gmra.mxu0 %v4848_v34 }
 0x12f   : > { %3532 = vmatmul.mubr.bf16.gmra.mxu1 %v4934_v11  ;;  %3548 = vmatpush3.bf16.msra.mxu0 %v3909_v24 }
 0x130   : > { %3580 = vmatpush3.bf16.msra.mxu1 %v3910_v1  ;;  %3535 = vmatprep.mubr.bf16.mxu1 %v4951_v41  ;;  %v2146_v1 = vrot.slane %v2144_v44, 5 }
 0x131   : > { %3581 = vmatprep.subr.bf16.mxu1 %v3912_v53  ;;  %3503 = vmatprep.mubr.bf16.mxu0 %v4868_v45 }
 0x132   : > { %3549 = vmatprep.subr.bf16.mxu0 %v3911_v18 }
 0x133   : > { %3550 = vmatpush3.bf16.msra.mxu0 %v3911_v18 }
 0x134   : > { %3582 = vmatpush3.bf16.msra.mxu1 %v3912_v53  ;;  %3551 = vmatprep.subr.bf16.mxu0 %v3913_v59 }
 0x135   : > { %3583 = vmatprep.subr.bf16.mxu1 %v3914_v6 }
 0x136   : > { %3504 = vmatmul.mubr.bf16.gmra.mxu0 %v4989_v61 }
 0x137   : > { %3536 = vmatmul.mubr.bf16.gmra.mxu1 %v4985_v12  ;;  %3552 = vmatpush3.bf16.msra.mxu0 %v3913_v59 }
 0x138   : > { %3584 = vmatpush3.bf16.msra.mxu1 %v3914_v6  ;;  %3587 = vmatprep.mubr.bf16.mxu1 %v4750_v57  ;;  %v5003_v57 = vsel %vm4996_vm7, %v468_v28, 0 }
 0x139   : > { %3585 = vmatprep.subr.bf16.mxu1 %v3916_v9  ;;  %3555 = vmatprep.mubr.bf16.mxu0 %v4724_v35  ;;  %v2125_v35 = vshrl.u32 %v5003_v57, 16  ;;  %v2128_v38 = vshll.u32 %v5003_v57, 16  ;;  %v3142_v54 = vcombine.low %v5003_v57, %v5007_v20 }
 0x13a   : > { %3553 = vmatprep.subr.bf16.mxu0 %v3915_v10 }
 0x13b   : > { %3554 = vmatpush3.bf16.msra.mxu0 %v3915_v10  ;;  %v2130_v17 = vrot.slane %v2128_v38, 5 }
 0x13c   : > { %3586 = vmatpush3.bf16.msra.mxu1 %v3916_v9  ;;  %3603 = vmatprep.subr.bf16.mxu0 %v3917_v51 }
 0x13d   : > { %3635 = vmatprep.subr.bf16.mxu1 %v3917_v51 }
 0x13e   : > { %3556 = vmatmul.mubr.bf16.vlgmr.msra.gmra.mxu0 %v4732_v46 }
 0x13f   : > { %3588 = vmatmul.mubr.bf16.vlgmr.msra.gmra.mxu1 %v4772_v25  ;;  %3604 = vmatpush3.bf16.msra.mxu0 %v3917_v51  ;;  %v2127_v25 = vrot.slane %v2125_v35, 4 }
 0x140   : > { %3643 = vmatpush3.bf16.msra.mxu1 %v3917_v51  ;;  %3591 = vmatprep.mubr.bf16.mxu1 %v4799_v2  ;;  %v2141_v2 = vor.u32 %v2140_v52, %v2136_v47 }
 0x141   : > { %3636 = vmatprep.subr.bf16.mxu1 %v3918_v36  ;;  %3559 = vmatprep.mubr.bf16.mxu0 %v4767_v14  ;;  %v2131_v46 = vor.u32 %v2130_v17, %v2127_v25  ;;  %v3921_v14 = vld [vmem:[#allocation8 + $0x218] sm:$0xff]  }
 0x142   : > { %3605 = vmatprep.subr.bf16.mxu0 %v3918_v36  ;;  %v2142_v30 = vrot.slane %v2141_v2, 4 }
 0x143   : > { %3606 = vmatpush3.bf16.msra.mxu0 %v3918_v36  ;;  %v2132_v40 = vrot.slane %v2131_v46, 4 }
 0x144   : > { %3644 = vmatpush3.bf16.msra.mxu1 %v3918_v36  ;;  %3607 = vmatprep.subr.bf16.mxu0 %v3919_v3 }
 0x145   : > { %3637 = vmatprep.subr.bf16.mxu1 %v3919_v3 }
 0x146   : > { %3560 = vmatmul.mubr.bf16.gmra.mxu0 %v4784_v49  ;;  %v2147_v49 = vsel %vm4672_vm3, %v2142_v30, %v2146_v1 }
 0x147   : > { %3592 = vmatmul.mubr.bf16.gmra.mxu1 %v4826_v55  ;;  %3608 = vmatpush3.bf16.msra.mxu0 %v3919_v3  ;;  %v3922_v55 = vld [vmem:[#allocation8 + $0x210] sm:$0xff]  }
 0x148   : > { %3645 = vmatpush3.bf16.msra.mxu1 %v3919_v3  ;;  %3595 = vmatprep.mubr.bf16.mxu1 %v4848_v34  ;;  %v2137_v34 = vsel %vm4672_vm3, %v2132_v40, %v2136_v47 }
 0x149   : > { %3638 = vmatprep.subr.bf16.mxu1 %v3920_v42  ;;  %3563 = vmatprep.mubr.bf16.mxu0 %v4816_v33  ;;  %v3923_v33 = vld [vmem:[#allocation8 + $0x208] sm:$0xff]   ;;  %v3151_v16 = vcombine.low %v2137_v34, %v2147_v49 }
 0x14a   : > { %3609 = vmatprep.subr.bf16.mxu0 %v3920_v42 }
 0x14b   : > { %3610 = vmatpush3.bf16.msra.mxu0 %v3920_v42 }
 0x14c   : > { %3646 = vmatpush3.bf16.msra.mxu1 %v3920_v42  ;;  %3611 = vmatprep.subr.bf16.mxu0 %v3921_v14 }
 0x14d   : > { %3639 = vmatprep.subr.bf16.mxu1 %v3921_v14 }
 0x14e   : > { %3564 = vmatmul.mubr.bf16.gmra.mxu0 %v4846_v32  ;;  %v3160_v32 = vrot.slane %v5003_v57, 9 }
 0x14f   : > { %3596 = vmatmul.mubr.bf16.gmra.mxu1 %v4868_v45  ;;  %3612 = vmatpush3.bf16.msra.mxu0 %v3921_v14  ;;  %v3924_v45 = vld [vmem:[#allocation8 + $0x200] sm:$0xff]  }
 0x150   : > { %3647 = vmatpush3.bf16.msra.mxu1 %v3921_v14  ;;  %3599 = vmatprep.mubr.bf16.mxu1 %v4989_v61  ;;  %v2334_v24 = vsel %vm4836_vm6, %v3160_v32, %v2333_v39 }
 0x151   : > { %3640 = vmatprep.subr.bf16.mxu1 %v3922_v55  ;;  %3567 = vmatprep.mubr.bf16.mxu0 %v4949_v23  ;;  %v2335_v23 = vrot.slane %v2333_v39, 4 }
 0x152   : > { %3613 = vmatprep.subr.bf16.mxu0 %v3922_v55 }
 0x153   : > { %3614 = vmatpush3.bf16.msra.mxu0 %v3922_v55 }
 0x154   : > { %3648 = vmatpush3.bf16.msra.mxu1 %v3922_v55  ;;  %3615 = vmatprep.subr.bf16.mxu0 %v3923_v33 }
 0x155   : > { %3641 = vmatprep.subr.bf16.mxu1 %v3923_v33 }
 0x156   : > { %3568 = vmatmul.mubr.bf16.gmra.mxu0 %v3142_v54 }
 0x157   : > { %3600 = vmatmul.mubr.bf16.gmra.mxu1 %v3151_v16  ;;  %3616 = vmatpush3.bf16.msra.mxu0 %v3923_v33 }
 0x158   : > { %3649 = vmatpush3.bf16.msra.mxu1 %v3923_v33  ;;  %3627 = vmatprep.mubr.bf16.mxu1 %v4934_v11  ;;  %v2337_v11 = vsel %vm4836_vm6, %v2335_v23, %v2336_v58 }
 0x159   : > { %3642 = vmatprep.subr.bf16.mxu1 %v3924_v45  ;;  %3619 = vmatprep.mubr.bf16.mxu0 %v4888_v8  ;;  %v3161_v8 = vcombine.low %v2334_v24, %v2337_v11 }
 0x15a   : > { %3617 = vmatprep.subr.bf16.mxu0 %v3924_v45 }
 0x15b   : > { %3618 = vmatpush3.bf16.msra.mxu0 %v3924_v45 }
 0x15c   : > { %3650 = vmatpush3.bf16.msra.mxu1 %v3924_v45 }
 0x15e   : > { %3620 = vmatmul.mubr.bf16.vlgmr.msra.gmra.mxu0 %v4906_v43 }
 0x15f   : > { %3628 = vmatmul.mubr.bf16.vlgmr.msra.gmra.mxu1 %v4951_v41  ;;  %3623 = vmatprep.mubr.bf16.mxu0 %v4911_v27 }
 0x160   : > { %3631 = vmatprep.mubr.bf16.mxu1 %v4985_v12 }
 0x166   : > { %3624 = vmatmul.mubr.bf16.gmra.mxu0 %v4927_v29 }
 0x167   : > { %3632 = vmatmul.mubr.bf16.gmra.mxu1 %v3161_v8 }
 0x19e   : > { %v3365_v63 = vpop.f32.mrf.mxu0 }
 0x19f   : > { %v3397_v56 = vpop.f32.mrf.mxu1 }
 0x1a0   : > { %v1029_v7 = vadd.f32 %v3397_v56, %v3365_v63  ;;  %v827_v41 = vpop.f32.mrf.mxu0 }
 0x1a1   : > { %v1020_v53 = vpop.f32.mrf.mxu1 }
 0x1a2   : > { %v1021_v62 = vadd.f32 %v1020_v53, %v827_v41  ;;  %v3366_v0 = vpop.f32.mrf.mxu0 }
 0x1a3   : > { %v3398_v5 = vpop.f32.mrf.mxu1 }
 0x1a4   : > { %v1032_v18 = vadd.f32 %v3398_v5, %v3366_v0  ;;  %v830_v50 = vpop.f32.mrf.mxu0 }
 0x1a5   : > { %v1023_v21 = vpop.f32.mrf.mxu1 }
 0x1a6   : > { %v1024_v19 = vadd.f32 %v1023_v21, %v830_v50  ;;  %v3369_v6 = vpop.f32.mrf.mxu0 }
 0x1a7   : > { %v3401_v43 = vpop.f32.mrf.mxu1 }
 0x1a8   : > { %v1045_v60 = vadd.f32 %v3401_v43, %v3369_v6  ;;  %v843_v27 = vpop.f32.mrf.mxu0 }
 0x1a9   : > { %v1036_v4 = vpop.f32.mrf.mxu1 }
 0x1aa   : > { %v1037_v12 = vadd.f32 %v1036_v4, %v843_v27  ;;  %v3370_v59 = vpop.f32.mrf.mxu0 }
 0x1ab   : > { %v3402_v29 = vpop.f32.mrf.mxu1 }
 0x1ac   : > { %v1048_v9 = vadd.f32 %v3402_v29, %v3370_v59  ;;  %v846_v61 = vpop.f32.mrf.mxu0 }
 0x1ad   : > { %v1039_v15 = vpop.f32.mrf.mxu1 }
 0x1ae   : > { %v1040_v10 = vadd.f32 %v1039_v15, %v846_v61  ;;  %v3373_v28 = vpop.f32.mrf.mxu0 }
 0x1af   : > { %v3405_v51 = vpop.f32.mrf.mxu1 }
 0x1b0   : > { %v1061_v48 = vadd.f32 %v3405_v51, %v3373_v28  ;;  %v859_v36 = vpop.f32.mrf.mxu0 }
 0x1b1   : > { %v1052_v31 = vpop.f32.mrf.mxu1 }
 0x1b2   : > { %v1053_v20 = vadd.f32 %v1052_v31, %v859_v36  ;;  %v3374_v35 = vpop.f32.mrf.mxu0 }
 0x1b3   : > { %v3406_v57 = vpop.f32.mrf.mxu1 }
 0x1b4   : > { %v1064_v22 = vadd.f32 %v3406_v57, %v3374_v35  ;;  %v862_v26 = vpop.f32.mrf.mxu0 }
 0x1b5   : > { %v1055_v38 = vpop.f32.mrf.mxu1 }
 0x1b6   : > { %v1056_v13 = vadd.f32 %v1055_v38, %v862_v26  ;;  %v3377_v17 = vpop.f32.mrf.mxu0 }
 0x1b7   : > { %v3409_v3 = vpop.f32.mrf.mxu1 }
 0x1b8   : > { %v1077_v47 = vadd.f32 %v3409_v3, %v3377_v17  ;;  %v875_v42 = vpop.f32.mrf.mxu0 }
 0x1b9   : > { %v1068_v25 = vpop.f32.mrf.mxu1 }
 0x1ba   : > { %v1069_v37 = vadd.f32 %v1068_v25, %v875_v42  ;;  %v3378_v2 = vpop.f32.mrf.mxu0 }
 0x1bb   : > { %v3410_v52 = vpop.f32.mrf.mxu1 }
 0x1bc   : > { %v1080_v44 = vadd.f32 %v3410_v52, %v3378_v2  ;;  %v878_v40 = vpop.f32.mrf.mxu0 }
 0x1bd   : > { %v1071_v46 = vpop.f32.mrf.mxu1 }
 0x1be   : > { %v5047_v30 = vadd.f32 %v1071_v46, %v878_v40  ;;  %v3429_v55 = vpop.f32.mrf.mxu0 }
 0x1bf   : > { %v3461_v14 = vpop.f32.mrf.mxu1  ;;  %v1346_v34 = vadd.f32 %v3429_v55, %v1029_v7 }
 0x1c0   : > { %v1281_v33 = vpop.f32.mrf.mxu0 }
 0x1c1   : > { %v1465_v1 = vpop.f32.mrf.mxu1  ;;  %v1530_v16 = vadd.f32 %v3461_v14, %v1346_v34  ;;  %v1344_v45 = vadd.f32 %v1281_v33, %v1021_v62 }
 0x1c2   : > { %v3430_v39 = vpop.f32.mrf.mxu0 }
 0x1c3   : > { %v3462_v49 = vpop.f32.mrf.mxu1  ;;  %v1528_v32 = vadd.f32 %v1465_v1, %v1344_v45  ;;  %v1347_v23 = vadd.f32 %v3430_v39, %v1032_v18 }
 0x1c4   : > { %v1284_v24 = vpop.f32.mrf.mxu0 }
 0x1c5   : > { %v1468_v54 = vpop.f32.mrf.mxu1  ;;  %v5049_v11 = vadd.f32 %v3462_v49, %v1347_v23  ;;  %v1345_v8 = vadd.f32 %v1284_v24, %v1024_v19 }
 0x1c6   : > { %v3433_v56 = vpop.f32.mrf.mxu0 }
 0x1c7   : > { %v3465_v58 = vpop.f32.mrf.mxu1  ;;  %v5051_v41 = vadd.f32 %v1468_v54, %v1345_v8  ;;  %v1350_v53 = vadd.f32 %v3433_v56, %v1045_v60 }
 0x1c8   : > { %v1297_v7 = vpop.f32.mrf.mxu0 }
 0x1c9   : > { %v1481_v63 = vpop.f32.mrf.mxu1  ;;  %v1534_v5 = vadd.f32 %v3465_v58, %v1350_v53  ;;  %v1348_v50 = vadd.f32 %v1297_v7, %v1037_v12 }
 0x1ca   : > { %v3434_v62 = vpop.f32.mrf.mxu0 }
 0x1cb   : > { %v3466_v0 = vpop.f32.mrf.mxu1  ;;  %v1532_v6 = vadd.f32 %v1481_v63, %v1348_v50  ;;  %v1351_v43 = vadd.f32 %v3434_v62, %v1048_v9 }
 0x1cc   : > { %v1300_v18 = vpop.f32.mrf.mxu0 }
 0x1cd   : > { %v1484_v21 = vpop.f32.mrf.mxu1  ;;  %v1535_v4 = vadd.f32 %v3466_v0, %v1351_v43  ;;  %v1349_v59 = vadd.f32 %v1300_v18, %v1040_v10 }
 0x1ce   : > { %v3437_v61 = vpop.f32.mrf.mxu0 }
 0x1cf   : > { %v3469_v27 = vpop.f32.mrf.mxu1  ;;  %v1533_v19 = vadd.f32 %v1484_v21, %v1349_v59  ;;  %v1354_v15 = vadd.f32 %v3437_v61, %v1061_v48 }
 0x1d0   : > { %v1313_v28 = vpop.f32.mrf.mxu0 }
 0x1d1   : > { %v1497_v29 = vpop.f32.mrf.mxu1  ;;  %v5053_v31 = vadd.f32 %v3469_v27, %v1354_v15  ;;  %v1352_v60 = vadd.f32 %v1313_v28, %v1053_v20 }
 0x1d2   : > { %v3438_v57 = vpop.f32.mrf.mxu0 }
 0x1d3   : > { %v3470_v51 = vpop.f32.mrf.mxu1  ;;  %v5055_v12 = vadd.f32 %v1497_v29, %v1352_v60  ;;  %v1355_v35 = vadd.f32 %v3438_v57, %v1064_v22 }
 0x1d4   : > { %v1316_v9 = vpop.f32.mrf.mxu0 }
 0x1d5   : > { %v1500_v36 = vpop.f32.mrf.mxu1  ;;  %v5057_v26 = vadd.f32 %v3470_v51, %v1355_v35  ;;  %v1353_v3 = vadd.f32 %v1316_v9, %v1056_v13 }
 0x1d6   : > { %v3441_v25 = vpop.f32.mrf.mxu0 }
 0x1d7   : > { %v3473_v38 = vpop.f32.mrf.mxu1  ;;  %v5059_v17 = vadd.f32 %v1500_v36, %v1353_v3  ;;  %v1358_v48 = vadd.f32 %v3441_v25, %v1077_v47 }
 0x1d8   : > { %v1329_v42 = vpop.f32.mrf.mxu0 }
 0x1d9   : > { %v1513_v10 = vpop.f32.mrf.mxu1  ;;  %v5061_v46 = vadd.f32 %v3473_v38, %v1358_v48  ;;  %v1356_v20 = vadd.f32 %v1329_v42, %v1069_v37 }
 0x1da   : > { %v3442_v14 = vpop.f32.mrf.mxu0 }
 0x1db   : > { %v3474_v52 = vpop.f32.mrf.mxu1  ;;  %v5063_v40 = vadd.f32 %v1513_v10, %v1356_v20  ;;  %v1359_v22 = vadd.f32 %v3442_v14, %v1080_v44 }
 0x1dc   : > { %v1332_v55 = vpop.f32.mrf.mxu0 }
 0x1dd   : > { %v1516_v2 = vpop.f32.mrf.mxu1  ;;  %v5065_v34 = vadd.f32 %v3474_v52, %v1359_v22  ;;  %v1357_v13 = vadd.f32 %v1332_v55, %v5047_v30 }
 0x1de   : > { %v3493_v33 = vpop.f32.mrf.mxu0 }
 0x1df   : > { %v3525_v1 = vpop.f32.mrf.mxu1  ;;  %v5068_v45 = vadd.f32 %v1516_v2, %v1357_v13  ;;  %v1736_v47 = vadd.f32 %v3493_v33, %v1530_v16 }
 0x1e0   : > { %v1671_v39 = vpop.f32.mrf.mxu0 }
 0x1e1   : > { %v1861_v49 = vpop.f32.mrf.mxu1  ;;  %v5072_v37 = vadd.f32 %v3525_v1, %v1736_v47  ;;  %v1734_v23 = vadd.f32 %v1671_v39, %v1528_v32 }
 0x1e2   : > { %v3494_v44 = vpop.f32.mrf.mxu0 }
 0x1e3   : > { %v5070_v54 = vpop.f32.mrf.mxu1  ;;  %v5076_v24 = vadd.f32 %v1861_v49, %v1734_v23 }
 0x1e4   : > { %v1674_v63 = vpop.f32.mrf.mxu0 }
 0x1e5   : > { %v5074_v58 = vpop.f32.mrf.mxu1 }
 0x1e6   : > { %v3497_v30 = vpop.f32.mrf.mxu0 }
 0x1e7   : > { %v3529_v8 = vpop.f32.mrf.mxu1  ;;  %v1740_v53 = vadd.f32 %v3497_v30, %v1534_v5 }
 0x1e8   : > { %v1687_v7 = vpop.f32.mrf.mxu0 }
 0x1e9   : > { %v1877_v56 = vpop.f32.mrf.mxu1  ;;  %v5078_v50 = vadd.f32 %v3529_v8, %v1740_v53  ;;  %v1738_v16 = vadd.f32 %v1687_v7, %v1532_v6 }
 0x1ea   : > { %v3498_v62 = vpop.f32.mrf.mxu0 }
 0x1eb   : > { %v3530_v0 = vpop.f32.mrf.mxu1  ;;  %v5080_v43 = vadd.f32 %v1877_v56, %v1738_v16  ;;  %v1741_v32 = vadd.f32 %v3498_v62, %v1535_v4  ;;  %v1737_v16 = vadd.f32 %v3494_v44, %v5049_v11 }
 0x1ec   : > { %v1690_v18 = vpop.f32.mrf.mxu0 }
 0x1ed   : > { %v1880_v21 = vpop.f32.mrf.mxu1  ;;  %v5082_v59 = vadd.f32 %v3530_v0, %v1741_v32  ;;  %v1739_v29 = vadd.f32 %v1690_v18, %v1533_v19 }
 0x1ee   : > { %v3501_v15 = vpop.f32.mrf.mxu0 }
 0x1ef   : > { %v3533_v27 = vpop.f32.mrf.mxu1  ;;  %v5084_v51 = vadd.f32 %v1880_v21, %v1739_v29  ;;  %v1735_v21 = vadd.f32 %v1674_v63, %v5051_v41  ;;  %v1744_v62 = vadd.f32 %v3501_v15, %v5053_v31 }
 0x1f0   : > { %v1703_v28 = vpop.f32.mrf.mxu0 }
 0x1f1   : > { %v1893_v61 = vpop.f32.mrf.mxu1  ;;  %5531 = vst [vmem:[#allocation40_spill] sm:$0xff] %v5084_v51  ;;  %v1742_v18 = vadd.f32 %v1703_v28, %v5055_v12  ;;  %v1927_v51 = vadd.f32 %v5070_v54, %v1737_v16 }
 0x1f2   : > { %v3502_v36 = vpop.f32.mrf.mxu0 }
 0x1f3   : > { %v3534_v5 = vpop.f32.mrf.mxu1  ;;  %v1932_v44 = vadd.f32 %v1893_v61, %v1742_v18 }
 0x1f4   : > { %v1706_v6 = vpop.f32.mrf.mxu0 }
 0x1f5   : > { %v1896_v60 = vpop.f32.mrf.mxu1  ;;  %v1743_v11 = vadd.f32 %v1706_v6, %v5059_v17 }
 0x1f6   : > { %v3505_v38 = vpop.f32.mrf.mxu0 }
 0x1f7   : > { %v5086_v57 = vpop.f32.mrf.mxu1  ;;  %v1748_v31 = vadd.f32 %v3505_v38, %v5061_v46  ;;  %v1933_v61 = vadd.f32 %v1896_v60, %v1743_v11 }
 0x1f8   : > { %v1719_v4 = vpop.f32.mrf.mxu0 }
 0x1f9   : > { %v1909_v35 = vpop.f32.mrf.mxu1  ;;  %v1746_v12 = vadd.f32 %v1719_v4, %v5063_v40 }
 0x1fa   : > { %v3506_v10 = vpop.f32.mrf.mxu0 }
 0x1fb   : > { %v3538_v9 = vpop.f32.mrf.mxu1  ;;  %v1749_v63 = vadd.f32 %v3506_v10, %v5065_v34  ;;  %v1938_v34 = vadd.f32 %v5086_v57, %v1748_v31  ;;  %v1936_v10 = vadd.f32 %v1909_v35, %v1746_v12 }
 0x1fc   : > { %v1722_v48 = vpop.f32.mrf.mxu0 }
 0x1fd   : > { %v1912_v3 = vpop.f32.mrf.mxu1  ;;  %v1747_v28 = vadd.f32 %v1722_v48, %v5068_v45 }
 0x1fe   : > { %v3557_v52 = vpop.f32.mrf.mxu0 }
 0x1ff   : > { %v3589_v25 = vpop.f32.mrf.mxu1  ;;  %v2110_v54 = vadd.f32 %v3557_v52, %v5072_v37  ;;  %v1937_v37 = vadd.f32 %v1912_v3, %v1747_v28 }
 0x200   : > { %v2045_v20 = vpop.f32.mrf.mxu0 }
 0x201   : > { %v5088_v19 = vpop.f32.mrf.mxu1  ;;  %v2316_v52 = vadd.f32 %v3589_v25, %v2110_v54 }
 0x202   : > { %v3558_v14 = vpop.f32.mrf.mxu0 }
 0x203   : > { %v5090_v42 = vpop.f32.mrf.mxu1  ;;  %v2111_v17 = vadd.f32 %v3558_v14, %v1927_v51 }
 0x204   : > { %v2048_v1 = vpop.f32.mrf.mxu0 }
 0x205   : > { %v5092_v2 = vpop.f32.mrf.mxu1  ;;  %v2317_v60 = vadd.f32 %v5090_v42, %v2111_v17 }
 0x206   : > { %5532 = vst [vmem:[#allocation41_spill] sm:$0xff] %v5092_v2  ;;  %v3561_v13 = vpop.f32.mrf.mxu0  ;;  %v1934_v2 = vadd.f32 %v3533_v27, %v1744_v62  ;;  %v2108_v27 = vadd.f32 %v2045_v20, %v5076_v24 }
 0x207   : > { %v5094_v22 = vpop.f32.mrf.mxu1  ;;  %v2114_v45 = vadd.f32 %v3561_v13, %v5078_v50 }
 0x208   : > { %5533 = vst [vmem:[#allocation42_spill] sm:$0xff] %v5094_v22  ;;  %v2061_v33 = vpop.f32.mrf.mxu0  ;;  %v1925_v22 = vadd.f32 %v5074_v58, %v1735_v21  ;;  %v2314_v51 = vadd.f32 %v5088_v19, %v2108_v27  ;;  %v5136_v19 = vld [vmem:[%s5540_s11] ss:$0 sm:$0xff] }
 0x209   : > { %v5096_v55 = vpop.f32.mrf.mxu1  ;;  %v2112_v20 = vadd.f32 %v2061_v33, %v5080_v43 }
 0x20a   : > { %5534 = vst [vmem:[#allocation43_spill] sm:$0xff] %v5096_v55  ;;  %v3562_v39 = vpop.f32.mrf.mxu0  ;;  %v2109_v46 = vadd.f32 %v2048_v1, %v1925_v22 }
 0x20b   : > { %v5098_v49 = vpop.f32.mrf.mxu1  ;;  %v2115_v57 = vadd.f32 %v3562_v39, %v5082_v59 }
 0x20c   : > { %5535 = vst [vmem:[#allocation44_spill] sm:$0xff] %v5098_v49  ;;  %v2064_v8 = vpop.f32.mrf.mxu0 }
 0x20d   : > { %v5100_v47 = vpop.f32.mrf.mxu1 }
 0x20e   : > { %5536 = vst [vmem:[#allocation45_spill] sm:$0xff] %v5100_v47  ;;  %v3565_v30 = vpop.f32.mrf.mxu0  ;;  %v1745_v47 = vadd.f32 %v3502_v36, %v5057_v26 }
 0x20f   : > { %v3597_v23 = vpop.f32.mrf.mxu1  ;;  %v2118_v36 = vadd.f32 %v3565_v30, %v1934_v2  ;;  %v5538_v1 = vld [vmem:[#allocation42_spill] sm:$0xff] }
 0x210   : > { %v2077_v0 = vpop.f32.mrf.mxu0  ;;  %v1935_v26 = vadd.f32 %v3534_v5, %v1745_v47  ;;  %v1939_v5 = vadd.f32 %v3538_v9, %v1749_v63  ;;  %v5537_v9 = vld [vmem:[#allocation41_spill] sm:$0xff]  ;;  %v2320_v13 = vadd.f32 %v5538_v1, %v2114_v45 }
 0x211   : > { %v2283_v56 = vpop.f32.mrf.mxu1  ;;  %v2116_v38 = vadd.f32 %v2077_v0, %v1932_v44  ;;  %v2324_v2 = vadd.f32 %v3597_v23, %v2118_v36  ;;  %v2315_v14 = vadd.f32 %v5537_v9, %v2109_v46 }
 0x212   : > { %v3566_v32 = vpop.f32.mrf.mxu0 }
 0x213   : > { %v3598_v53 = vpop.f32.mrf.mxu1  ;;  %v2119_v40 = vadd.f32 %v3566_v32, %v1935_v26  ;;  %v2322_v50 = vadd.f32 %v2283_v56, %v2116_v38  ;;  %v5542_v21 = vld [vmem:[#allocation44_spill] sm:$0xff] }
 0x214   : > { %v2080_v49 = vpop.f32.mrf.mxu0  ;;  %v5142_v62 = vadd.f32 %v5542_v21, %v2115_v57 }
 0x215   : > { %v2286_v7 = vpop.f32.mrf.mxu1  ;;  %v2117_v47 = vadd.f32 %v2080_v49, %v1933_v61  ;;  %v2325_v22 = vadd.f32 %v3598_v53, %v2119_v40  ;;  %v5539_v49 = vld [vmem:[#allocation40_spill] sm:$0xff]  ;;  %v5541_v53 = vld [vmem:[#allocation43_spill] sm:$0xff]  ;;  %v5543_v12 = vld [vmem:[#allocation45_spill] sm:$0xff] }
 0x216   : > { %v3569_v41 = vpop.f32.mrf.mxu0  ;;  %v2113_v23 = vadd.f32 %v2064_v8, %v5539_v49  ;;  %v5139_v16 = vadd.f32 %v5541_v53, %v2112_v20 }
 0x217   : > { %v5106_v29 = vpop.f32.mrf.mxu1  ;;  %v2122_v30 = vadd.f32 %v3569_v41, %v1938_v34  ;;  %v2323_v59 = vadd.f32 %v2286_v7, %v2117_v47 }
 0x218   : > { %v2093_v58 = vpop.f32.mrf.mxu0  ;;  %v5152_v63 = vadd.f32 %v5543_v12, %v2113_v23 }
 0x219   : > { %v5109_v55 = vpop.f32.mrf.mxu1  ;;  %v2120_v42 = vadd.f32 %v2093_v58, %v1936_v10  ;;  %v5155_v26 = vadd.f32 %v5106_v29, %v2122_v30 }
 0x21a   : > { %v3570_v4 = vpop.f32.mrf.mxu0 }
 0x21b   : > { %v5117_v15 = vpop.f32.mrf.mxu1  ;;  %v2123_v8 = vadd.f32 %v3570_v4, %v1939_v5  ;;  %v5159_v36 = vadd.f32 %v5109_v55, %v2120_v42 }
 0x21c   : > { %v2096_v24 = vpop.f32.mrf.mxu0 }
 0x21d   : > { %v5122_v6 = vpop.f32.mrf.mxu1  ;;  %v5170_v46 = vadd.f32 %v5117_v15, %v2123_v8  ;;  %v2121_v29 = vadd.f32 %v2096_v24, %v1937_v37 }
 0x21e   : > { %v3621_v3 = vpop.f32.mrf.mxu0 }
 0x21f   : > { %v3629_v48 = vpop.f32.mrf.mxu1  ;;  %v2506_v0 = vadd.f32 %v3621_v3, %v2316_v52 }
 0x220   : > { %v2514_v25 = vadd.f32 %v3629_v48, %v2324_v2  ;;  %v2441_v33 = vpop.f32.mrf.mxu0 }
 0x221   : > { %v2473_v35 = vpop.f32.mrf.mxu1  ;;  %v2504_v32 = vadd.f32 %v2441_v33, %v2314_v51  ;;  %v2529_v11 = vadd.f32 %v5136_v19, %v2506_v0 }
 0x222   : > { %v2512_v39 = vadd.f32 %v2473_v35, %v2322_v50  ;;  %v5146_v41 = vadd.f32 %v5136_v19, %v2514_v25  ;;  %v3622_v44 = vpop.f32.mrf.mxu0 }
 0x223   : > { %v3630_v43 = vpop.f32.mrf.mxu1  ;;  %v2527_v28 = vadd.f32 %v5136_v19, %v2504_v32  ;;  %v2507_v54 = vadd.f32 %v3622_v44, %v2317_v60  ;;  %v2567_v55 = vmul.f32 %v2529_v11, %v2529_v11 }
 0x224   : > { %v2515_v56 = vadd.f32 %v3630_v43, %v2325_v22  ;;  %v5162_v58 = vadd.f32 %v5136_v19, %v2512_v39  ;;  %v2444_v17 = vpop.f32.mrf.mxu0 }
 0x225   : > { %v2476_v18 = vpop.f32.mrf.mxu1  ;;  %v5173_v38 = vadd.f32 %v5136_v19, %v2507_v54  ;;  %v2505_v40 = vadd.f32 %v2444_v17, %v2315_v14  ;;  %v2565_v4 = vmul.f32 %v2527_v28, %v2527_v28 }
 0x226   : > { %v5149_v7 = vadd.f32 %v5136_v19, %v2515_v56  ;;  %v2513_v31 = vadd.f32 %v2476_v18, %v2323_v59  ;;  %v3625_v5 = vpop.f32.mrf.mxu0 }
 0x227   : > { %v3633_v45 = vpop.f32.mrf.mxu1  ;;  %v2568_v48 = vmul.f32 %v5173_v38, %v5173_v38  ;;  %v2604_v52 = vpack.c.bf16 %v5173_v38, %v2529_v11  ;;  %v2528_v2 = vadd.f32 %v5136_v19, %v2505_v40  ;;  %v2510_v60 = vadd.f32 %v3625_v5, %v2320_v13 }
 0x228   : > { %v2608_v27 = vpack.c.bf16 %v5149_v7, %v5146_v41  ;;  %v5167_v61 = vadd.f32 %v5136_v19, %v2513_v31  ;;  %v2457_v14 = vpop.f32.mrf.mxu0  ;;  %v2518_v5 = vadd.f32 %v3633_v45, %v5155_v26 }
 0x229   : > { %v2619_v20 = vshrl.u32 %v2604_v52, 16  ;;  %v2622_v57 = vshll.u32 %v2604_v52, 16  ;;  %v2543_v35 = vadd.f32 %v2528_v2, %v2527_v28  ;;  %v2566_v9 = vmul.f32 %v2528_v2, %v2528_v2  ;;  %v2489_v1 = vpop.f32.mrf.mxu1 }
 0x22a   : > { %v2647_v34 = vshrl.u32 %v2608_v27, 16  ;;  %v2607_v10 = vpack.c.bf16 %v5167_v61, %v5162_v58  ;;  %v2650_v37 = vshll.u32 %v2608_v27, 16  ;;  %v2603_v3 = vpack.c.bf16 %v2528_v2, %v2527_v28  ;;  %v3626_v21 = vpop.f32.mrf.mxu0 }
 0x22b   : > { %v2621_v49 = vrot.slane %v2619_v20, 7  ;;  %v2544_v30 = vadd.f32 %v2543_v35, %v2529_v11  ;;  %v2581_v0 = vadd.f32 %v2566_v9, %v2565_v4  ;;  %v3634_v44 = vpop.f32.mrf.mxu1  ;;  %v2327_v4 = vadd.f32 %v5122_v6, %v2121_v29 }
 0x22c   : > { %v2649_v47 = vrot.slane %v2647_v34, 7  ;;  %v2640_v24 = vshrl.u32 %v2607_v10, 16  ;;  %v2643_v51 = vshll.u32 %v2607_v10, 16  ;;  %v2612_v43 = vshrl.u32 %v2603_v3, 16  ;;  %v2460_v52 = vpop.f32.mrf.mxu0 }
 0x22d   : > { %v2615_v59 = vshll.u32 %v2603_v3, 16  ;;  %v2624_v33 = vor.u32 %v2622_v57, %v2621_v49  ;;  %v2695_v39 = vsel %vm5182_vm10, %v2621_v49, 0  ;;  %v2582_v32 = vadd.f32 %v2581_v0, %v2567_v55 }
 0x22e   : > { %v2652_v50 = vor.u32 %v2650_v37, %v2649_v47  ;;  %v2699_v22 = vsel %vm5182_vm10, %v2649_v47, 0  ;;  %v2642_v25 = vrot.slane %v2640_v24, 7  ;;  %v3176_v8 = vcombine.low %v2695_v39, %v2695_v39  ;;  %v2492_v47 = vpop.f32.mrf.mxu1 }
 0x22f   : > { %v3188_v23 = vcombine.low %v2699_v22, %v2699_v22  ;;  %v2614_v18 = vrot.slane %v2612_v43, 7  ;;  %v2687_v31 = vsel %vm5182_vm10, 0, %v2624_v33  ;;  %v2508_v2 = vadd.f32 %v2457_v14, %v5139_v16 }
 0x230   : > { %v2691_v13 = vsel %vm5182_vm10, 0, %v2652_v50  ;;  %v2645_v42 = vor.u32 %v2643_v51, %v2642_v25  ;;  %v2698_v12 = vsel %vm5182_vm10, %v2642_v25, 0  ;;  %v3174_v27 = vcombine.low %v2687_v31, %v2687_v31  ;;  %2795 = vst [vmem:[%s5194_s8 + $0x14] sm:$0xf] %v3176_v8 }
 0x231   : > { %v3186_v56 = vcombine.low %v2691_v13, %v2691_v13  ;;  %v3187_v53 = vcombine.high %v2691_v13, %v2691_v13  ;;  %2807 = vst [vmem:[%s5194_s8 + $0x44] sm:$0xf] %v3188_v23  ;;  %v3175_v17 = vcombine.high %v2687_v31, %v2687_v31  ;;  %v2617_v40 = vor.u32 %v2615_v59, %v2614_v18 }
 0x232   : > { %v2690_v11 = vsel %vm5182_vm10, 0, %v2645_v42  ;;  %v2694_v55 = vsel %vm5182_vm10, %v2614_v18, 0  ;;  %v3185_v10 = vcombine.low %v2698_v12, %v2698_v12  ;;  %2793 = vst [vmem:[%s5194_s8 + $0xc] sm:$0xf] %v3174_v27  ;;  %v2545_v6 = vadd.f32 %v2544_v30, %v5173_v38 }
 0x233   : > { %2805 = vst [vmem:[%s5194_s8 + $0x3c] sm:$0xf] %v3186_v56  ;;  %2806 = vst [vmem:[%s5194_s8 + $0x40] sm:$0xf] %v3187_v53  ;;  %v3183_v28 = vcombine.low %v2690_v11, %v2690_v11  ;;  %v3184_v54 = vcombine.high %v2690_v11, %v2690_v11  ;;  %v3173_v34 = vcombine.low %v2694_v55, %v2694_v55  ;;  %v2686_v37 = vsel %vm5182_vm10, 0, %v2617_v40 }
 0x234   : > { %2794 = vst [vmem:[%s5194_s8 + $0x10] sm:$0xf] %v3175_v17  ;;  %v2583_v29 = vadd.f32 %v2582_v32, %v2568_v48  ;;  %v3171_v24 = vcombine.low %v2686_v37, %v2686_v37  ;;  %v3172_v51 = vcombine.high %v2686_v37, %v2686_v37  ;;  %2804 = vst [vmem:[%s5194_s8 + $0x38] sm:$0xf] %v3185_v10 }
 0x235   : > { %2802 = vst [vmem:[%s5194_s8 + $0x30] sm:$0xf] %v3183_v28  ;;  %2803 = vst [vmem:[%s5194_s8 + $0x34] sm:$0xf] %v3184_v54  ;;  %v2533_v26 = vadd.f32 %v5136_v19, %v2510_v60  ;;  %v2516_v45 = vadd.f32 %v2489_v1, %v5159_v36  ;;  %v2531_v20 = vadd.f32 %v5136_v19, %v2508_v2 }
 0x236   : > { %2792 = vst [vmem:[%s5194_s8 + $0x8] sm:$0xf] %v3173_v34  ;;  %v2511_v57 = vadd.f32 %v3626_v21, %v5142_v62  ;;  %v2519_v35 = vadd.f32 %v3634_v44, %v5170_v46  ;;  %v2509_v16 = vadd.f32 %v2460_v52, %v5152_v63  ;;  %v2573_v38 = vmul.f32 %v5162_v58, %v5162_v58 }
 0x237   : > { %2790 = vst [vmem:[%s5194_s8] sm:$0xf] %v3171_v24  ;;  %2791 = vst [vmem:[%s5194_s8 + $0x4] sm:$0xf] %v3172_v51  ;;  %v2517_v48 = vadd.f32 %v2492_v47, %v2327_v4  ;;  %v2546_v9 = vadd.f32 %v2545_v6, %v2531_v20  ;;  %v2569_v14 = vmul.f32 %v2531_v20, %v2531_v20 }
 0x238   : > { %v2534_v60 = vadd.f32 %v5136_v19, %v2511_v57  ;;  %v5232_v36 = vadd.f32 %v5136_v19, %v2519_v35  ;;  %v5236_v62 = vmul.f32 %v5167_v61, %v5167_v61  ;;  %v5239_v46 = vadd.f32 %v5136_v19, %v2518_v5 }
 0x239   : > { %v2532_v63 = vadd.f32 %v5136_v19, %v2509_v16  ;;  %v5243_v50 = vadd.f32 %v5136_v19, %v2517_v48  ;;  %v2571_v22 = vmul.f32 %v2533_v26, %v2533_v26  ;;  %v2584_v3 = vadd.f32 %v2583_v29, %v2569_v14 }
 0x23a   : > { %v5246_v25 = vadd.f32 %v5136_v19, %v2516_v45  ;;  %v2606_v1 = vpack.c.bf16 %v2534_v60, %v2533_v26  ;;  %v2610_v49 = vpack.c.bf16 %v5232_v36, %v5239_v46  ;;  %v2572_v13 = vmul.f32 %v2534_v60, %v2534_v60 }
 0x23b   : > { %v2547_v23 = vadd.f32 %v2546_v9, %v2532_v63  ;;  %v2570_v30 = vmul.f32 %v2532_v63, %v2532_v63  ;;  %v2605_v0 = vpack.c.bf16 %v2532_v63, %v2531_v20  ;;  %v2575_v35 = vmul.f32 %v5146_v41, %v5146_v41 }
 0x23c   : > { %v2633_v43 = vshrl.u32 %v2606_v1, 16  ;;  %v2636_v59 = vshll.u32 %v2606_v1, 16  ;;  %v2609_v42 = vpack.c.bf16 %v5243_v50, %v5246_v25  ;;  %v2661_v33 = vshrl.u32 %v2610_v49, 16 }
 0x23d   : > { %v2664_v39 = vshll.u32 %v2610_v49, 16  ;;  %v2548_v56 = vadd.f32 %v2547_v23, %v2533_v26  ;;  %v2585_v19 = vadd.f32 %v2584_v3, %v2570_v30  ;;  %v2626_v21 = vshrl.u32 %v2605_v0, 16 }
 0x23e   : > { %v2635_v53 = vrot.slane %v2633_v43, 7  ;;  %v2629_v8 = vshll.u32 %v2605_v0, 16  ;;  %v2654_v32 = vshrl.u32 %v2609_v42, 16  ;;  %v2663_v18 = vrot.slane %v2661_v33, 7 }
 0x23f   : > { %v2549_v11 = vadd.f32 %v2548_v56, %v2534_v60  ;;  %v2586_v44 = vadd.f32 %v2585_v19, %v2571_v22  ;;  %v2657_v31 = vshll.u32 %v2609_v42, 16  ;;  %v2628_v54 = vrot.slane %v2626_v21, 7 }
 0x240   : > { %v2638_v12 = vor.u32 %v2636_v59, %v2635_v53  ;;  %v2697_v28 = vsel %vm5182_vm10, %v2635_v53, 0  ;;  %v2656_v27 = vrot.slane %v2654_v32, 7  ;;  %v2666_v40 = vor.u32 %v2664_v39, %v2663_v18 }
 0x241   : > { %v3182_v17 = vcombine.low %v2697_v28, %v2697_v28  ;;  %v2701_v55 = vsel %vm5182_vm10, %v2663_v18, 0  ;;  %v2550_v4 = vadd.f32 %v2549_v11, %v5162_v58  ;;  %v2587_v5 = vadd.f32 %v2586_v44, %v2572_v13 }
 0x242   : > { %v2689_v34 = vsel %vm5182_vm10, 0, %v2638_v12  ;;  %v3194_v10 = vcombine.low %v2701_v55, %v2701_v55  ;;  %v2631_v52 = vor.u32 %v2629_v8, %v2628_v54  ;;  %v2693_v6 = vsel %vm5182_vm10, 0, %v2666_v40 }
 0x243   : > { %v3180_v37 = vcombine.low %v2689_v34, %v2689_v34  ;;  %v3181_v2 = vcombine.high %v2689_v34, %v2689_v34  ;;  %2801 = vst [vmem:[%s5194_s8 + $0x2c] sm:$0xf] %v3182_v17  ;;  %v2696_v29 = vsel %vm5182_vm10, %v2628_v54, 0  ;;  %v3192_v58 = vcombine.low %v2693_v6, %v2693_v6 }
 0x244   : > { %v3193_v47 = vcombine.high %v2693_v6, %v2693_v6  ;;  %2813 = vst [vmem:[%s5194_s8 + $0x5c] sm:$0xf] %v3194_v10  ;;  %v2588_v24 = vadd.f32 %v2587_v5, %v2573_v38  ;;  %v2688_v51 = vsel %vm5182_vm10, 0, %v2631_v52  ;;  %v3179_v20 = vcombine.low %v2696_v29, %v2696_v29 }
 0x245   : > { %2799 = vst [vmem:[%s5194_s8 + $0x24] sm:$0xf] %v3180_v37  ;;  %2800 = vst [vmem:[%s5194_s8 + $0x28] sm:$0xf] %v3181_v2  ;;  %v3177_v26 = vcombine.low %v2688_v51, %v2688_v51  ;;  %v3178_v45 = vcombine.high %v2688_v51, %v2688_v51  ;;  %v2551_v57 = vadd.f32 %v2550_v4, %v5167_v61  ;;  %v2700_v48 = vsel %vm5182_vm10, %v2656_v27, 0 }
 0x246   : > { %2811 = vst [vmem:[%s5194_s8 + $0x54] sm:$0xf] %v3192_v58  ;;  %2812 = vst [vmem:[%s5194_s8 + $0x58] sm:$0xf] %v3193_v47  ;;  %v2589_v16 = vadd.f32 %v2588_v24, %v5236_v62  ;;  %v2659_v38 = vor.u32 %v2657_v31, %v2656_v27  ;;  %v3191_v9 = vcombine.low %v2700_v48, %v2700_v48 }
 0x247   : > { %2796 = vst [vmem:[%s5194_s8 + $0x18] sm:$0xf] %v3177_v26  ;;  %2797 = vst [vmem:[%s5194_s8 + $0x1c] sm:$0xf] %v3178_v45  ;;  %v2552_v61 = vadd.f32 %v2551_v57, %v5146_v41  ;;  %v2576_v14 = vmul.f32 %v5149_v7, %v5149_v7  ;;  %v2577_v41 = vmul.f32 %v5246_v25, %v5246_v25 }
 0x248   : > { %2798 = vst [vmem:[%s5194_s8 + $0x20] sm:$0xf] %v3179_v20  ;;  %v2590_v60 = vadd.f32 %v2589_v16, %v2575_v35  ;;  %v2692_v62 = vsel %vm5182_vm10, 0, %v2659_v38  ;;  %2810 = vst [vmem:[%s5194_s8 + $0x50] sm:$0xf] %v3191_v9 }
 0x249   : > { %v2553_v63 = vadd.f32 %v2552_v61, %v5149_v7  ;;  %v3189_v22 = vcombine.low %v2692_v62, %v2692_v62  ;;  %v3190_v3 = vcombine.high %v2692_v62, %v2692_v62  ;;  %v2578_v7 = vmul.f32 %v5243_v50, %v5243_v50 }
 0x24a   : > { %v2591_v15 = vadd.f32 %v2590_v60, %v2576_v14 }
 0x24b   : > { %v2554_v1 = vadd.f32 %v2553_v63, %v5246_v25  ;;  %2808 = vst [vmem:[%s5194_s8 + $0x48] sm:$0xf] %v3189_v22  ;;  %2809 = vst [vmem:[%s5194_s8 + $0x4c] sm:$0xf] %v3190_v3 }
 0x24c   : > { %v2592_v49 = vadd.f32 %v2591_v15, %v2577_v41 }
 0x24d   : > { %4048 = shalt.err (!%p4045_p8)
}
 0x24e   : > { %s4049_s26 = scalar_lea.hbm %s5298_s12, 1536  ;;  %s4053_s5 = scalar_lea.hbm %s5547_s0, 6144 }
 0x24f   : > { %p4050_p9 = scmp.ne.s32.totalorder %s5298_s12, %s4049_s26  ;;  %p4054_p10 = scmp.lt.s32.totalorder %s5298_s12, %s5547_s0 }
 0x250   : > { %p4055_p12 = scmp.lt.s32.totalorder %s4053_s5, %s4049_s26 }
 0x251   : > { %p4051_p2 = pnand %p4050_p9, %p5548_p0 }
 0x252   : > { %p4056_p13 = por %p4055_p12, %p4054_p10 }
 0x253   : > { %p4052_p4 = pneg %p4051_p2 }
 0x255   : > { %p4057_p6 = pnand %p4056_p13, %p4052_p4 }
 0x257   : > { %4060 = shalt.err (!%p4057_p6)
}
 0x258   : > { %s4254_s1 = smov 64   ;;  %s4255_s11 = smov 4   ;;  %v2555_v25 = vadd.f32 %v2554_v1, %v5243_v50  ;;  %v2579_v23 = vmul.f32 %v5239_v46, %v5239_v46  ;;  %v2593_v30 = vadd.f32 %v2592_v49, %v2578_v7  ;;  %v2580_v13 = vmul.f32 %v5232_v36, %v5232_v36 }
 0x259   : > { %3675 = dma.vmem_to_hbm [thread:$0]  (%p5548_p0), %s5291_s29, 1536, %s5298_s12, %s5309_s10, %s4254_s1, %s4254_s1, %s4255_s11  }
 0x25a   : > { %v2556_v0 = vadd.f32 %v2555_v25, %v5239_v46  ;;  %v2594_v43 = vadd.f32 %v2593_v30, %v2579_v23  ;;  %s425_s8 = sand.u32 1, %s4185_s22   ;;  %s3199_s6 = sshll.u32 %s5546_s7, 1 }
 0x25b   : > { %s3057_s16 = sshll.u32 %s425_s8, 1  ;;  %s2847_s27 = sadd.s32 %s5524_s19, %s3199_s6 }
 0x25c   : > { %v2557_v59 = vadd.f32 %v2556_v0, %v5232_v36  ;;  %v2595_v42 = vadd.f32 %v2594_v43, %v2580_v13  ;;  %s3200_s2 = sshll.u32 %s2847_s27, 5  ;;  %s427_s29 = scalar_lea.vmem [#allocation11], %s3057_s16 }
 0x25d   : > { %s2854_s17 = sshll.u32 %s427_s29, 4  ;;  %s5549_s12 = sld [smem:[#allocation52_spill]]  ;;  %s2855_s17 = int_to_ptr.vmem [resolvable:$true] %s2854_s17 }
 0x25e   : > { %v2558_v33 = vrot.slane %v2557_v59, 4  ;;  %v2596_v39 = vrot.slane %v2595_v42, 4  ;;  %s2820_s7 = scalar_lea.sflag [#allocation12], %s425_s8  ;;  %s4061_s19 = scalar_lea.vmem %s2855_s17, 32 }
 0x25f   : > { %p4062_p0 = scmp.ne.s32.totalorder %s2855_s17, %s4061_s19  ;;  %p5551_p7 = scmp.ne.s32.totalorder %s5495_s9, 0 }
 0x260   : > { %v2559_v56 = vadd.f32 %v2558_v33, %v2557_v59  ;;  %v2597_v50 = vadd.f32 %v2596_v39, %v2595_v42  ;;  %s4256_s21 = smov [#allocation11]  }
 0x261   : > { %p4063_p3 = pnand %p4062_p0, %p5551_p7  ;;  %s4065_s30 = sshll.u32 %s4256_s21, 4  ;;  %s4066_s30 = int_to_ptr.vmem [resolvable:$false] %s4065_s30 }
 0x262   : > { %v2560_v19 = vrot.slane %v2559_v56, 2  ;;  %v2598_v53 = vrot.slane %v2597_v50, 2  ;;  %s4067_s15 = scalar_lea.vmem %s4066_s30, 64  ;;  %p4068_p11 = scmp.lt.s32.totalorder %s2855_s17, %s4066_s30 }
 0x263   : > { %s5550_s3 = smov %s5549_s12  ;;  %s5345_s10 = scalar_lea.hbm %s5549_s12, %s3200_s2 }
 0x264   : > { %v2561_v21 = vadd.f32 %v2560_v19, %v2559_v56  ;;  %v2599_v46 = vadd.f32 %v2598_v53, %v2597_v50  ;;  %p4064_p1 = pneg %p4063_p3  ;;  %p4069_p5 = scmp.lt.s32.totalorder %s4067_s15, %s4061_s19 }
 0x266   : > { %v2562_v8 = vrot.slane %v2561_v21, 1  ;;  %v2600_v32 = vrot.slane %v2599_v46, 1  ;;  %p4070_p8 = por %p4069_p5, %p4068_p11 }
 0x268   : > { %v2563_v36 = vadd.f32 %v2562_v8, %v2561_v21  ;;  %v2601_v18 = vadd.f32 %v2600_v32, %v2599_v46  ;;  %p4071_p9 = pnand %p4070_p8, %p4064_p1 }
 0x26a   : > { %2564 = vst [vmem:[%s427_s29] sm:$0x1] %v2563_v36  ;;  %2602 = vst [vmem:[%s427_s29 + $0x1] sm:$0x1] %v2601_v18 }
 0x26b   : > { %4074 = shalt.err (!%p4071_p9)
}
 0x26c   : > { %s4075_s26 = scalar_lea.hbm %s5345_s10, 32  ;;  %s4079_s5 = scalar_lea.hbm %s5550_s3, 128 }
 0x26d   : > { %p4076_p2 = scmp.ne.s32.totalorder %s5345_s10, %s4075_s26  ;;  %p4080_p12 = scmp.lt.s32.totalorder %s5345_s10, %s5550_s3 }
 0x26e   : > { %p4081_p13 = scmp.lt.s32.totalorder %s4079_s5, %s4075_s26 }
 0x26f   : > { %p4077_p4 = pnand %p4076_p2, %p5551_p7 }
 0x270   : > { %p4082_p6 = por %p4081_p13, %p4080_p12 }
 0x271   : > { %p4078_p10 = pneg %p4077_p4 }
 0x273   : > { %p4083_p0 = pnand %p4082_p6, %p4078_p10 }
 0x275   : > { %4086 = shalt.err (!%p4083_p0)
}
 0x276   : > { %3676 = dma.vmem_to_hbm [thread:$0]  (%p5551_p7), %s2855_s17, 32, %s5345_s10, %s2820_s7  }
 0x277 PF: > { %s5552_s1 = sld [smem:[#allocation24_spill]]  ;;  %p3703_p3 = scmp.ge.s32.totalorder %s4245_s13, 2 }
 0x278   : > { %s5553_s11 = sld [smem:[#allocation35_spill]] }
 0x27d   : > { %s2866_s8 = sand.u32 1, %s5552_s1  }
 0x27e   : > { %p5554_p1 = scmp.ne.s32.totalorder %s5553_s11, 0  ;;  %s2867_s16 = scalar_lea.sflag [#allocation4], %s2866_s8 }
 0x280   : > { %p3694_p11 = pnand %p3703_p3, %p5554_p1 }
 0x282   : > { %p3695_p5 = pneg %p3694_p11 }
 0x284   : > { %4172 = dma.done.wait (%p3695_p5), %s2867_s16, 1536  }
 0x285   : > { %4174 = vsyncadd (%p3695_p5), %s2867_s16, 4294965760  ;;  %s5555_s6 = sld [smem:[#allocation19_spill]] }
 0x286   : > { %s5556_s27 = sld [smem:[#allocation38_spill]] }
 0x28b   : > { %s2875_s2 = sand.u32 1, %s5555_s6  }
 0x28c   : > { %p5557_p8 = scmp.ne.s32.totalorder %s5556_s27, 0  ;;  %s2876_s9 = scalar_lea.sflag [#allocation12], %s2875_s2 }
 0x28e   : > { %p3697_p9 = pnand %p3703_p3, %p5557_p8 }
 0x290   : > { %p3698_p2 = pneg %p3697_p9 }
 0x292   : > { %4176 = dma.done.wait (%p3698_p2), %s2876_s9, 32  }
 0x293   : > { %4178 = vsyncadd (%p3698_p2), %s2876_s9, 4294967264  ;;  %s30_s13 = sadd.s32 1, %s4245_s13   ;;  %s5559_s17 = sld [smem:[#allocation20_spill]] }
 0x294   : > { %p5371_p7 = scmp.ge.s32.totalorder %s30_s13, 6   ;;  %s5560_s24 = sld [smem:[#allocation37_spill]] }
 0x295   : > { %s5561_s18 = sld [smem:[#allocation22_spill]]  ;;  %s5563_s12 = smov %s5600_s23 }
 0x296   : > { %s5562_s25 = sld [smem:[#allocation23_spill]]  ;;  %s5573_s21 = smov %s4185_s22 }
 0x297   : > { %s5564_s10 = sld [smem:[#allocation25_spill]]  ;;  %s5578_s26 = smov %s5563_s12 }
 0x298   : > { %s5565_s7 = sld [smem:[#allocation36_spill]]  ;;  %s5579_s27 = smov %s4209_s28 }
 0x299   : > { %s5566_s30 = sld [smem:[#allocation27_spill]]  ;;  %s5574_s22 = smov %s5559_s17 }
 0x29a   : > { %s5567_s19 = sld [smem:[#allocation28_spill]]  ;;  %s5576_s23 = smov %s5560_s24 }
 0x29b   : > { %s5568_s8 = sld [smem:[#allocation39_spill]]  ;;  %s5577_s24 = smov %s5561_s18 }
 0x29c   : > { %s5569_s9 = sld [smem:[#allocation31_spill]] }
 0x29d   : > { %s5570_s15 = sld [smem:[#allocation32_spill]]  ;;  %s5580_s28 = smov %s5564_s10 }
 0x29e   : > { %s5571_s11 = sld [smem:[#allocation33_spill]]  ;;  %s5581_s29 = smov %s5565_s7 }
 0x29f   : > { %s5572_s14 = sld [smem:[#allocation34_spill]] }
 0x2a0   : > { %s5582_s7 = smov %s5567_s19 }
 0x2a1   :  { %29 = sbr.rel (!%p5371_p7) target bundleno = 25 (0x19), region = 138 }
 0x2a3   : > { %s5583_s10 = smov %s5570_s15 }
 0x2a5   : > { %s5584_s12 = smov %s5572_s14 }
 0x2a6   :  { %2881 = vsyncpa [#allocation3], 1 }
 0x2a7   :  { %2883 = vsyncpa [#allocation3 + $0x1], 1 }
 0x2a8   :  { %2884 = vsyncpa [#allocation6], 1 }
 0x2a9   :  { %2886 = vsyncpa [#allocation6 + $0x1], 1 }
 0x2aa   :  { %2887 = vsyncpa [#allocation9], 1 }
 0x2ab   :  { %2888 = vsyncpa [#allocation4], 1 }
 0x2ac   :  { %2890 = vsyncpa [#allocation4 + $0x1], 1 }
 0x2ad   :  { %2891 = vsyncpa [#allocation12], 1 }
 0x2ae   :  { %2893 = vsyncpa [#allocation12 + $0x1], 1 }

</bundles_post_ra>
